<compile_context>
chip_gen: v6e
topology: v6e:2x2x1
jax: 0.10.0
libtpu: 0.0.40
codegen_flags: <defaults>
</compile_context>

<pallas_src>
import functools

import jax
import jax.numpy as jnp
from jax.experimental import pallas as pl
from jax.experimental.pallas import tpu as pltpu

LANE = 128
_VMEM_LIMIT = 32 * 1024 * 1024   # explicit; fits v5e/v6e/v7x scoped budgets


def _round_up(x, m):
    return (x + m - 1) // m * m


def _pick(dim, candidates):
    """Largest candidate tile that divides `dim` (dim is a multiple of 128/8)."""
    for c in candidates:
        if dim % c == 0:
            return c
    return dim


# -----------------------------------------------------------------------------
# Pass 1: tiled conv-as-matmul (bf16 operands, f32 accum) + partial BN stats
# -----------------------------------------------------------------------------
def _matmul_stats_kernel(p_ref, w_ref, out_ref, stats_ref, acc_ref):
    k = pl.program_id(2)

    @pl.when(k == 0)
    def _():
        acc_ref[...] = jnp.zeros_like(acc_ref)

    acc_ref[...] += jnp.dot(p_ref[...], w_ref[...],
                            preferred_element_type=jnp.float32)

    @pl.when(k == pl.num_programs(2) - 1)
    def _():
        conv = acc_ref[...]
        out_ref[...] = conv.astype(out_ref.dtype)
        # Tile-local partial BN statistics (reduced across M tiles outside).
        s = jnp.sum(conv, axis=0, keepdims=True)
        sq = jnp.sum(conv * conv, axis=0, keepdims=True)
        stats_ref[0] = jnp.concatenate([s, sq], axis=0)


def conv_matmul_stats(patches, w_mat, *, tm_max=256, tk_max=512, tn_max=256):
    """(M,K)@(K,Cout) conv matmul, lane-dense padded, bf16 MXU operands.

    Returns:
      conv_pad : (Mpad, Cpad) f32 conv output
      stats    : (Mtiles, 2, Cpad) f32 per-M-tile [sum, sum_sq]
      mp, cp   : padded dims (for residual alignment / slicing)
    """
    M, K = patches.shape
    C = w_mat.shape[1]

    kp = _round_up(K, LANE)
    cp = _round_up(C, LANE)
    tk = _pick(kp, (tk_max, 256, 128))
    tn = _pick(cp, (tn_max, 128))
    tm = min(tm_max, _round_up(M, 16))
    mp = _round_up(M, tm)
    m_tiles = mp // tm

    # Zero padding is exact: zero patch rows -> zero conv rows -> zero stats.
    p_pad = jnp.pad(patches.astype(jnp.bfloat16), ((0, mp - M), (0, kp - K)))
    w_pad = jnp.pad(w_mat.astype(jnp.bfloat16), ((0, kp - K), (0, cp - C)))

    cost = pl.CostEstimate(
        flops=2 * mp * kp * cp,
        transcendentals=0,
        bytes_accessed=mp * kp * 2 + kp * cp * 2 + mp * cp * 4)

    conv_pad, stats = pl.pallas_call(
        _matmul_stats_kernel,
        grid=(m_tiles, cp // tn, kp // tk),
        in_specs=[
            pl.BlockSpec((tm, tk), lambda i, j, k: (i, k)),
            pl.BlockSpec((tk, tn), lambda i, j, k: (k, j)),
        ],
        out_specs=[
            pl.BlockSpec((tm, tn), lambda i, j, k: (i, j)),
            pl.BlockSpec((1, 2, tn), lambda i, j, k: (i, 0, j)),
        ],
        out_shape=[
            jax.ShapeDtypeStruct((mp, cp), jnp.float32),
            jax.ShapeDtypeStruct((m_tiles, 2, cp), jnp.float32),
        ],
        scratch_shapes=[pltpu.VMEM((tm, tn), jnp.float32)],
        compiler_params=pltpu.CompilerParams(
            dimension_semantics=("parallel", "parallel", "arbitrary"),
            vmem_limit_bytes=_VMEM_LIMIT),
        cost_estimate=cost,
    )(p_pad, w_pad)
    return conv_pad, stats, mp, cp


# -----------------------------------------------------------------------------
# Pass 2: fused BN-affine (+ shortcut BN + residual add) (+ ReLU), tiled (M, C)
# -----------------------------------------------------------------------------
def _bn_act_kernel(*refs, relu, has_res, res_affine):
    if has_res and res_affine:
        conv_ref, sc_ref, sh_ref, res_ref, rsc_ref, rsh_ref, out_ref = refs
    elif has_res:
        conv_ref, sc_ref, sh_ref, res_ref, out_ref = refs
    else:
        conv_ref, sc_ref, sh_ref, out_ref = refs

    y = conv_ref[...] * sc_ref[...] + sh_ref[...]
    if has_res:
        r = res_ref[...].astype(jnp.float32)
        if res_affine:
            r = r * rsc_ref[...] + rsh_ref[...]
        y = y + r
    if relu:
        y = jnp.maximum(y, 0.0)
    out_ref[...] = y.astype(out_ref.dtype)


def bn_act(conv_pad, scale, shift, residual=None, r_scale=None, r_shift=None,
           *, relu, out_dtype=jnp.float32):
    mp, cp = conv_pad.shape
    tm = _pick(mp, (512, 256, 128))
    tn = _pick(cp, (256, 128))

    tile = pl.BlockSpec((tm, tn), lambda i, j: (i, j))
    row = pl.BlockSpec((1, tn), lambda i, j: (0, j))

    inputs = [conv_pad, scale.reshape(1, cp), shift.reshape(1, cp)]
    in_specs = [tile, row, row]
    has_res = residual is not None
    res_affine = has_res and (r_scale is not None)
    res_bytes = 0
    if has_res:
        inputs.append(residual)
        in_specs.append(tile)
        res_bytes = mp * cp * residual.dtype.itemsize
        if res_affine:
            inputs += [r_scale.reshape(1, cp), r_shift.reshape(1, cp)]
            in_specs += [row, row]

    kernel = functools.partial(_bn_act_kernel, relu=relu, has_res=has_res,
                               res_affine=res_affine)
    out_itemsize = jnp.dtype(out_dtype).itemsize
    return pl.pallas_call(
        kernel,
        grid=(mp // tm, cp // tn),
        in_specs=in_specs,
        out_specs=tile,
        out_shape=jax.ShapeDtypeStruct((mp, cp), out_dtype),
        compiler_params=pltpu.CompilerParams(
            dimension_semantics=("parallel", "parallel"),
            vmem_limit_bytes=_VMEM_LIMIT),
        cost_estimate=pl.CostEstimate(
            flops=(4 if has_res else 2) * mp * cp, transcendentals=0,
            bytes_accessed=mp * cp * 4 + res_bytes + mp * cp * out_itemsize),
    )(*inputs)


# -----------------------------------------------------------------------------
# Glue: im2col patches, weight reshaping, BN stat reduction, orchestration
# -----------------------------------------------------------------------------
def im2col(x_nhwc, ksize, stride, pad):
    N, H, W, C = x_nhwc.shape
    xp = jnp.pad(x_nhwc, ((0, 0), (pad, pad), (pad, pad), (0, 0)))
    Ho = (H + 2 * pad - ksize) // stride + 1
    Wo = (W + 2 * pad - ksize) // stride + 1
    cols = []
    for ky in range(ksize):
        for kx in range(ksize):
            cols.append(xp[:,
                           ky:ky + (Ho - 1) * stride + 1:stride,
                           kx:kx + (Wo - 1) * stride + 1:stride,
                           :])
    patches = jnp.concatenate(cols, axis=-1)           # (N, Ho, Wo, K*K*C)
    return patches.reshape(N * Ho * Wo, ksize * ksize * C), Ho, Wo


def _w_to_mat(w_oihw):
    # (Cout, Cin, KH, KW) -> (KH*KW*Cin, Cout) matching im2col channel order
    cout, cin, kh, kw = w_oihw.shape
    return jnp.transpose(w_oihw, (2, 3, 1, 0)).reshape(kh * kw * cin, cout)


def _bn_scale_shift(stats, m_true, gamma, beta, cp, eps):
    """Reduce per-tile (sum, sum_sq) partials -> per-channel scale/shift (f32)."""
    tot = jnp.sum(stats, axis=0)                       # (2, Cpad)
    mean = tot[0] / m_true
    var = jnp.maximum(tot[1] / m_true - mean * mean, 0.0)   # biased variance
    g = jnp.pad(gamma.astype(jnp.float32), (0, cp - gamma.shape[0]))
    b = jnp.pad(beta.astype(jnp.float32), (0, cp - beta.shape[0]))
    scale = g * jax.lax.rsqrt(var + eps)
    shift = b - mean * scale
    return scale, shift


def basic_block_forward(x_nchw, params, stride=1, eps=1e-5):
    """Matches BasicBlock.forward (PyTorch, training-mode BN)."""
    N, Cin, H, W = x_nchw.shape
    planes = params["conv1_w"].shape[0]
    x_nhwc = jnp.transpose(x_nchw, (0, 2, 3, 1)).astype(jnp.float32)

    # ---- stage 1: out = relu(bn1(conv1(x))) --------------------------------
    p1, Ho, Wo = im2col(x_nhwc, 3, stride, 1)
    c1, st1, _, cp1 = conv_matmul_stats(p1, _w_to_mat(params["conv1_w"]))
    s1, b1 = _bn_scale_shift(st1, p1.shape[0], params["bn1_g"],
                             params["bn1_b"], cp1, eps)
    # bf16 output: only ever consumed as a bf16 MXU operand by conv2, so this
    # halves HBM traffic on the stage-1/stage-2 intermediate with no accuracy
    # change (the matmul would cast it to bf16 anyway).
    out1 = bn_act(c1, s1, b1, relu=True, out_dtype=jnp.bfloat16)
    out1_nhwc = out1[:p1.shape[0], :planes].reshape(N, Ho, Wo, planes)

    # ---- stage 2 matmul: conv2(out1) + partial BN stats --------------------
    p2, Ho2, Wo2 = im2col(out1_nhwc, 3, 1, 1)
    M2 = p2.shape[0]
    c2, st2, mp2, cp2 = conv_matmul_stats(p2, _w_to_mat(params["conv2_w"]))
    s2, b2 = _bn_scale_shift(st2, M2, params["bn2_g"], params["bn2_b"],
                             cp2, eps)

    # ---- shortcut (its BN, if any, is folded into the final fused kernel) --
    if stride != 1 or Cin != planes:
        ps, _, _ = im2col(x_nhwc, 1, stride, 0)
        csc, stsc, mpsc, cpsc = conv_matmul_stats(ps, _w_to_mat(params["sc_w"]))
        assert (mpsc, cpsc) == (mp2, cp2)
        rs, rb = _bn_scale_shift(stsc, ps.shape[0], params["sc_g"],
                                 params["sc_b"], cpsc, eps)
        res = csc
    else:
        # Identity shortcut: no BN affine needed (skipped in the fused kernel).
        res = jnp.pad(x_nhwc.reshape(N * H * W, Cin),
                      ((0, mp2 - M2), (0, cp2 - Cin)))
        rs = rb = None

    # ---- stage 2 finalize: out = relu(bn2(conv2) + shortcut) ---------------
    out2 = bn_act(c2, s2, b2, residual=res, r_scale=rs, r_shift=rb, relu=True)
    out_nhwc = out2[:M2, :planes].reshape(N, Ho2, Wo2, planes)
    return jnp.transpose(out_nhwc, (0, 3, 1, 2))        # back to NCHW


# -----------------------------------------------------------------------------
# Parameters (deterministic, synthetic) and pure-JAX reference
# -----------------------------------------------------------------------------
def init_params(key, in_planes, planes, stride):
    k = jax.random.split(key, 3)
    params = {
        "conv1_w": 0.1 * jax.random.normal(k[0], (planes, in_planes, 3, 3),
                                           jnp.float32),
        "bn1_g": 1.0 + 0.1 * jnp.arange(planes, dtype=jnp.float32),
        "bn1_b": 0.05 * jnp.arange(planes, dtype=jnp.float32),
        "conv2_w": 0.1 * jax.random.normal(k[1], (planes, planes, 3, 3),
                                           jnp.float32),
        "bn2_g": 1.0 - 0.05 * jnp.arange(planes, dtype=jnp.float32),
        "bn2_b": -0.02 * jnp.arange(planes, dtype=jnp.float32),
    }
    if stride != 1 or in_planes != planes:
        params["sc_w"] = 0.1 * jax.random.normal(k[2], (planes, in_planes, 1, 1),
                                                 jnp.float32)
        params["sc_g"] = 1.0 + 0.03 * jnp.arange(planes, dtype=jnp.float32)
        params["sc_b"] = 0.01 * jnp.arange(planes, dtype=jnp.float32)
    return params


def reference_basic_block(x, params, stride, eps=1e-5):
    def conv(x, w, s, pad):
        return jax.lax.conv_general_dilated(
            x, w, (s, s), ((pad, pad), (pad, pad)),
            dimension_numbers=("NCHW", "OIHW", "NCHW"))

    def bn(x, g, b):
        mean = jnp.mean(x, axis=(0, 2, 3), keepdims=True)
        var = jnp.mean((x - mean) ** 2, axis=(0, 2, 3), keepdims=True)
        return ((x - mean) * jax.lax.rsqrt(var + eps)
                * g.reshape(1, -1, 1, 1) + b.reshape(1, -1, 1, 1))

    planes = params["conv1_w"].shape[0]
    out = jax.nn.relu(bn(conv(x, params["conv1_w"], stride, 1),
                         params["bn1_g"], params["bn1_b"]))
    out = bn(conv(out, params["conv2_w"], 1, 1),
             params["bn2_g"], params["bn2_b"])
    if stride != 1 or x.shape[1] != planes:
        sc = bn(conv(x, params["sc_w"], stride, 0),
                params["sc_g"], params["sc_b"])
    else:
        sc = x
    return jax.nn.relu(out + sc)


if __name__ == "__main__":
    key = jax.random.PRNGKey(0)
    kx, kp1, kp2 = jax.random.split(key, 3)
    x = jax.random.normal(kx, (2, 4, 16, 16), jnp.float32)

    fwd = jax.jit(basic_block_forward, static_argnames=("stride",))

    # Case 1: identity shortcut (stride=1, in_planes == planes)
    params = init_params(kp1, 4, 4, 1)
    out = jax.block_until_ready(fwd(x, params, stride=1))
    ref = reference_basic_block(x, params, 1)
    assert out.shape == (2, 4, 16, 16)
    # bf16 MXU operands (f32 accumulation) -> bf16-level tolerance vs f32 ref.
    assert jnp.allclose(out, ref, atol=5e-2, rtol=5e-2), "identity-block mismatch"

    # Case 2: projection shortcut (stride=2, in_planes != planes)
    params2 = init_params(kp2, 4, 8, 2)
    out2 = jax.block_until_ready(fwd(x, params2, stride=2))
    ref2 = reference_basic_block(x, params2, 2)
    assert out2.shape == (2, 8, 8, 8)
    assert jnp.allclose(out2, ref2, atol=5e-2, rtol=5e-2), "projection-block mismatch"

    print("KERNEL_OK")
</pallas_src>

<mosaic_0001>
module attributes {stable_mosaic.version = 11 : i64} {
  func.func @_matmul_stats_kernel(%arg0: i32, %arg1: i32, %arg2: i32, %arg3: memref<256x128xbf16, #tpu.memory_space<vmem>>, %arg4: memref<128x128xbf16, #tpu.memory_space<vmem>>, %arg5: memref<256x128xf32, #tpu.memory_space<vmem>>, %arg6: memref<1x2x128xf32, #tpu.memory_space<vmem>>, %arg7: memref<256x128xf32, #tpu.memory_space<vmem>>) attributes {dimension_semantics = [#tpu.dimension_semantics<parallel>, #tpu.dimension_semantics<parallel>, #tpu.dimension_semantics<arbitrary>], iteration_bounds = array<i64: 2, 1, 1>, scalar_prefetch = 0 : i64, scratch_operands = 1 : i64, tpu.core_type = #tpu.core_type<tc>, window_params = [{transform_indices = @transform_0, window_bounds = array<i64: 256, 128>}, {transform_indices = @transform_1, window_bounds = array<i64: 128, 128>}, {transform_indices = @transform_2, window_bounds = array<i64: 256, 128>}, {transform_indices = @transform_3, window_bounds = array<i64: 1, 2, 128>}]} {
    %c0_i32 = arith.constant 0 : i32
    %0 = arith.cmpi eq, %arg2, %c0_i32 : i32
    %1 = arith.extui %0 : i1 to i32
    %c0_i32_0 = arith.constant 0 : i32
    %2 = arith.cmpi ne, %1, %c0_i32_0 : i32
    scf.if %2 {
      %cst_10 = arith.constant 0.000000e+00 : f32
      %12 = vector.broadcast %cst_10 : f32 to vector<256x128xf32>
      %c0_11 = arith.constant 0 : index
      %c0_12 = arith.constant 0 : index
      %13 = vector.load %arg7[%c0_11, %c0_12] : memref<256x128xf32, #tpu.memory_space<vmem>>, vector<256x128xf32>
      tpu.vector_store %arg7[%c0_11, %c0_12], %12 {strides = array<i32>} : memref<256x128xf32, #tpu.memory_space<vmem>>, vector<256x128xf32>,
    } else {
    }
    %c0 = arith.constant 0 : index
    %c0_1 = arith.constant 0 : index
    %3 = vector.load %arg7[%c0, %c0_1] : memref<256x128xf32, #tpu.memory_space<vmem>>, vector<256x128xf32>
    %c0_2 = arith.constant 0 : index
    %c0_3 = arith.constant 0 : index
    %4 = vector.load %arg3[%c0_2, %c0_3] : memref<256x128xbf16, #tpu.memory_space<vmem>>, vector<256x128xbf16>
    %c0_4 = arith.constant 0 : index
    %c0_5 = arith.constant 0 : index
    %5 = vector.load %arg4[%c0_4, %c0_5] : memref<128x128xbf16, #tpu.memory_space<vmem>>, vector<128x128xbf16>
    %cst = arith.constant dense<0.000000e+00> : vector<256x128xf32>
    %6 = tpu.matmul %4, %5, %cst {dimension_numbers = #tpu.dot_dimension_numbers<[1], [0], [0], [1], [0, 0, 1, 1], [], []>} : vector<256x128xbf16>, vector<128x128xbf16>, vector<256x128xf32> -> vector<256x128xf32>
    %7 = arith.addf %3, %6 : vector<256x128xf32>
    %c0_6 = arith.constant 0 : index
    %c0_7 = arith.constant 0 : index
    %8 = vector.load %arg7[%c0_6, %c0_7] : memref<256x128xf32, #tpu.memory_space<vmem>>, vector<256x128xf32>
    tpu.vector_store %arg7[%c0_6, %c0_7], %7 {strides = array<i32>} : memref<256x128xf32, #tpu.memory_space<vmem>>, vector<256x128xf32>,
    %c0_i32_8 = arith.constant 0 : i32
    %9 = arith.cmpi eq, %arg2, %c0_i32_8 : i32
    %10 = arith.extui %9 : i1 to i32
    %c0_i32_9 = arith.constant 0 : i32
    %11 = arith.cmpi ne, %10, %c0_i32_9 : i32
    scf.if %11 {
      %c0_10 = arith.constant 0 : index
      %c0_11 = arith.constant 0 : index
      %12 = vector.load %arg7[%c0_10, %c0_11] : memref<256x128xf32, #tpu.memory_space<vmem>>, vector<256x128xf32>
      %c0_12 = arith.constant 0 : index
      %c0_13 = arith.constant 0 : index
      %13 = vector.load %arg5[%c0_12, %c0_13] : memref<256x128xf32, #tpu.memory_space<vmem>>, vector<256x128xf32>
      tpu.vector_store %arg5[%c0_12, %c0_13], %12 {strides = array<i32>} : memref<256x128xf32, #tpu.memory_space<vmem>>, vector<256x128xf32>,
      %cst_14 = arith.constant dense<0.000000e+00> : vector<128xf32>
      %14 = vector.multi_reduction <add>, %12, %cst_14 [0] : vector<256x128xf32> to vector<128xf32>
      %15 = vector.shape_cast %14 : vector<128xf32> to vector<1x128xf32>
      %16 = arith.mulf %12, %12 : vector<256x128xf32>
      %cst_15 = arith.constant dense<0.000000e+00> : vector<128xf32>
      %17 = vector.multi_reduction <add>, %16, %cst_15 [0] : vector<256x128xf32> to vector<128xf32>
      %18 = vector.shape_cast %17 : vector<128xf32> to vector<1x128xf32>
      %19 = tpu.concatenate %15, %18 in 0 : vector<1x128xf32>, vector<1x128xf32> -> vector<2x128xf32>
      %c0_16 = arith.constant 0 : index
      %c0_17 = arith.constant 0 : index
      %c0_18 = arith.constant 0 : index
      %20 = vector.load %arg6[%c0_16, %c0_17, %c0_18] : memref<1x2x128xf32, #tpu.memory_space<vmem>>, vector<1x2x128xf32>
      %21 = vector.shape_cast %20 : vector<1x2x128xf32> to vector<2x128xf32>
      %22 = vector.shape_cast %19 : vector<2x128xf32> to vector<1x2x128xf32>
      tpu.vector_store %arg6[%c0_16, %c0_17, %c0_18], %22 {strides = array<i32>} : memref<1x2x128xf32, #tpu.memory_space<vmem>>, vector<1x2x128xf32>,
    } else {
    }
    return
  }
  func.func @transform_0(%arg0: i32, %arg1: i32, %arg2: i32) -> (i32, i32) {
    %c0_i32 = arith.constant 0 : i32
    return %arg0, %arg2 : i32, i32
  }
  func.func @transform_1(%arg0: i32, %arg1: i32, %arg2: i32) -> (i32, i32) {
    %c0_i32 = arith.constant 0 : i32
    return %arg2, %arg1 : i32, i32
  }
  func.func @transform_2(%arg0: i32, %arg1: i32, %arg2: i32) -> (i32, i32) {
    %c0_i32 = arith.constant 0 : i32
    return %arg0, %arg1 : i32, i32
  }
  func.func @transform_3(%arg0: i32, %arg1: i32, %arg2: i32) -> (i32, i32, i32) {
    %c0_i32 = arith.constant 0 : i32
    %c0_i32_0 = arith.constant 0 : i32
    return %arg0, %c0_i32, %arg1 : i32, i32, i32
  }
}

module attributes {stable_mosaic.version = 11 : i64} {
  func.func @_bn_act_kernel(%arg0: i32, %arg1: i32, %arg2: memref<512x128xf32, #tpu.memory_space<vmem>>, %arg3: memref<1x128xf32, #tpu.memory_space<vmem>>, %arg4: memref<1x128xf32, #tpu.memory_space<vmem>>, %arg5: memref<512x128xbf16, #tpu.memory_space<vmem>>) attributes {dimension_semantics = [#tpu.dimension_semantics<parallel>, #tpu.dimension_semantics<parallel>], iteration_bounds = array<i64: 1, 1>, scalar_prefetch = 0 : i64, scratch_operands = 0 : i64, tpu.core_type = #tpu.core_type<tc>, window_params = [{transform_indices = @transform_0, window_bounds = array<i64: 512, 128>}, {transform_indices = @transform_1, window_bounds = array<i64: 1, 128>}, {transform_indices = @transform_2, window_bounds = array<i64: 1, 128>}, {transform_indices = @transform_3, window_bounds = array<i64: 512, 128>}]} {
    %c0 = arith.constant 0 : index
    %c0_0 = arith.constant 0 : index
    %0 = vector.load %arg2[%c0, %c0_0] : memref<512x128xf32, #tpu.memory_space<vmem>>, vector<512x128xf32>
    %c0_1 = arith.constant 0 : index
    %c0_2 = arith.constant 0 : index
    %1 = vector.load %arg3[%c0_1, %c0_2] : memref<1x128xf32, #tpu.memory_space<vmem>>, vector<1x128xf32>
    %2 = vector.broadcast %1 : vector<1x128xf32> to vector<512x128xf32>
    %3 = arith.mulf %0, %2 : vector<512x128xf32>
    %c0_3 = arith.constant 0 : index
    %c0_4 = arith.constant 0 : index
    %4 = vector.load %arg4[%c0_3, %c0_4] : memref<1x128xf32, #tpu.memory_space<vmem>>, vector<1x128xf32>
    %5 = vector.broadcast %4 : vector<1x128xf32> to vector<512x128xf32>
    %6 = arith.addf %3, %5 : vector<512x128xf32>
    %cst = arith.constant 0.000000e+00 : f32
    %7 = vector.broadcast %cst : f32 to vector<512x128xf32>
    %8 = arith.maximumf %6, %7 : vector<512x128xf32>
    %9 = arith.truncf %8 : vector<512x128xf32> to vector<512x128xbf16>
    %c0_5 = arith.constant 0 : index
    %c0_6 = arith.constant 0 : index
    %10 = vector.load %arg5[%c0_5, %c0_6] : memref<512x128xbf16, #tpu.memory_space<vmem>>, vector<512x128xbf16>
    tpu.vector_store %arg5[%c0_5, %c0_6], %9 {strides = array<i32>} : memref<512x128xbf16, #tpu.memory_space<vmem>>, vector<512x128xbf16>,
    return
  }
  func.func @transform_0(%arg0: i32, %arg1: i32) -> (i32, i32) {
    %c0_i32 = arith.constant 0 : i32
    return %arg0, %arg1 : i32, i32
  }
  func.func @transform_1(%arg0: i32, %arg1: i32) -> (i32, i32) {
    %c0_i32 = arith.constant 0 : i32
    %c0_i32_0 = arith.constant 0 : i32
    return %c0_i32, %arg1 : i32, i32
  }
  func.func @transform_2(%arg0: i32, %arg1: i32) -> (i32, i32) {
    %c0_i32 = arith.constant 0 : i32
    %c0_i32_0 = arith.constant 0 : i32
    return %c0_i32, %arg1 : i32, i32
  }
  func.func @transform_3(%arg0: i32, %arg1: i32) -> (i32, i32) {
    %c0_i32 = arith.constant 0 : i32
    return %arg0, %arg1 : i32, i32
  }
}

module attributes {stable_mosaic.version = 11 : i64} {
  func.func @_bn_act_kernel(%arg0: i32, %arg1: i32, %arg2: memref<512x128xf32, #tpu.memory_space<vmem>>, %arg3: memref<1x128xf32, #tpu.memory_space<vmem>>, %arg4: memref<1x128xf32, #tpu.memory_space<vmem>>, %arg5: memref<512x128xf32, #tpu.memory_space<vmem>>, %arg6: memref<512x128xf32, #tpu.memory_space<vmem>>) attributes {dimension_semantics = [#tpu.dimension_semantics<parallel>, #tpu.dimension_semantics<parallel>], iteration_bounds = array<i64: 1, 1>, scalar_prefetch = 0 : i64, scratch_operands = 0 : i64, tpu.core_type = #tpu.core_type<tc>, window_params = [{transform_indices = @transform_0, window_bounds = array<i64: 512, 128>}, {transform_indices = @transform_1, window_bounds = array<i64: 1, 128>}, {transform_indices = @transform_2, window_bounds = array<i64: 1, 128>}, {transform_indices = @transform_3, window_bounds = array<i64: 512, 128>}, {transform_indices = @transform_4, window_bounds = array<i64: 512, 128>}]} {
    %c0 = arith.constant 0 : index
    %c0_0 = arith.constant 0 : index
    %0 = vector.load %arg2[%c0, %c0_0] : memref<512x128xf32, #tpu.memory_space<vmem>>, vector<512x128xf32>
    %c0_1 = arith.constant 0 : index
    %c0_2 = arith.constant 0 : index
    %1 = vector.load %arg3[%c0_1, %c0_2] : memref<1x128xf32, #tpu.memory_space<vmem>>, vector<1x128xf32>
    %2 = vector.broadcast %1 : vector<1x128xf32> to vector<512x128xf32>
    %3 = arith.mulf %0, %2 : vector<512x128xf32>
    %c0_3 = arith.constant 0 : index
    %c0_4 = arith.constant 0 : index
    %4 = vector.load %arg4[%c0_3, %c0_4] : memref<1x128xf32, #tpu.memory_space<vmem>>, vector<1x128xf32>
    %5 = vector.broadcast %4 : vector<1x128xf32> to vector<512x128xf32>
    %6 = arith.addf %3, %5 : vector<512x128xf32>
    %c0_5 = arith.constant 0 : index
    %c0_6 = arith.constant 0 : index
    %7 = vector.load %arg5[%c0_5, %c0_6] : memref<512x128xf32, #tpu.memory_space<vmem>>, vector<512x128xf32>
    %8 = arith.addf %6, %7 : vector<512x128xf32>
    %cst = arith.constant 0.000000e+00 : f32
    %9 = vector.broadcast %cst : f32 to vector<512x128xf32>
    %10 = arith.maximumf %8, %9 : vector<512x128xf32>
    %c0_7 = arith.constant 0 : index
    %c0_8 = arith.constant 0 : index
    %11 = vector.load %arg6[%c0_7, %c0_8] : memref<512x128xf32, #tpu.memory_space<vmem>>, vector<512x128xf32>
    tpu.vector_store %arg6[%c0_7, %c0_8], %10 {strides = array<i32>} : memref<512x128xf32, #tpu.memory_space<vmem>>, vector<512x128xf32>,
    return
  }
  func.func @transform_0(%arg0: i32, %arg1: i32) -> (i32, i32) {
    %c0_i32 = arith.constant 0 : i32
    return %arg0, %arg1 : i32, i32
  }
  func.func @transform_1(%arg0: i32, %arg1: i32) -> (i32, i32) {
    %c0_i32 = arith.constant 0 : i32
    %c0_i32_0 = arith.constant 0 : i32
    return %c0_i32, %arg1 : i32, i32
  }
  func.func @transform_2(%arg0: i32, %arg1: i32) -> (i32, i32) {
    %c0_i32 = arith.constant 0 : i32
    %c0_i32_0 = arith.constant 0 : i32
    return %c0_i32, %arg1 : i32, i32
  }
  func.func @transform_3(%arg0: i32, %arg1: i32) -> (i32, i32) {
    %c0_i32 = arith.constant 0 : i32
    return %arg0, %arg1 : i32, i32
  }
  func.func @transform_4(%arg0: i32, %arg1: i32) -> (i32, i32) {
    %c0_i32 = arith.constant 0 : i32
    return %arg0, %arg1 : i32, i32
  }
}

</mosaic_0001>

<bundles_post_ra>
// kernel: basic_block_forward.5
= control target key start
LH: loop header
LB: loop body
LE: loop exit
PB: predicated region body
PF: predicated region fallthrough
CT: control target
= control target key end

     0   :  { %s1375_s0 = inlined_call_operand.vmem [shape: f32[512,128], index: 0, kind: input, shape index: {}]   ;;  %s1376_s1 = inlined_call_operand.vmem [shape: f32[1,128], index: 1, kind: input, shape index: {}]   ;;  %s1377_s2 = inlined_call_operand.vmem [shape: f32[1,128], index: 2, kind: input, shape index: {}]   ;;  %s1378_s3 = inlined_call_operand.vmem [shape: bf16[512,128], index: 3, kind: output, shape index: {}]  }
   0x1   :  { %v14_v0 = vld [vmem:[%s1375_s0] sm:$0xff]  ;;  %v15_v1 = vld [vmem:[%s1375_s0 + $0x8] sm:$0xff]  ;;  %v16_v6 = vld [vmem:[%s1375_s0 + $0x10] sm:$0xff] }
   0x2   :  { %v958_v2 = vld [vmem:[%s1376_s1] ss:$0 sm:$0xff]  ;;  %v17_v7 = vld [vmem:[%s1375_s0 + $0x18] sm:$0xff]  ;;  %v19_v11 = vld [vmem:[%s1375_s0 + $0x28] sm:$0xff] }
   0x3   :  { %v85_v3 = vmul.f32 %v958_v2, %v14_v0  ;;  %v86_v4 = vmul.f32 %v958_v2, %v15_v1  ;;  %v965_v5 = vld [vmem:[%s1377_s2] ss:$0 sm:$0xff]  ;;  %v87_v8 = vmul.f32 %v958_v2, %v16_v6  ;;  %v88_v9 = vmul.f32 %v958_v2, %v17_v7  ;;  %v20_v12 = vld [vmem:[%s1375_s0 + $0x30] sm:$0xff]  ;;  %v21_v17 = vld [vmem:[%s1375_s0 + $0x38] sm:$0xff] }
   0x4   :  { %v18_v10 = vld [vmem:[%s1375_s0 + $0x20] sm:$0xff]  ;;  %v90_v16 = vmul.f32 %v958_v2, %v19_v11  ;;  %v91_v20 = vmul.f32 %v958_v2, %v20_v12  ;;  %v92_v21 = vmul.f32 %v958_v2, %v21_v17  ;;  %v23_v27 = vld [vmem:[%s1375_s0 + $0x48] sm:$0xff]  ;;  %v24_v32 = vld [vmem:[%s1375_s0 + $0x50] sm:$0xff] }
   0x5   :  { %v156_v13 = vadd.f32 %v965_v5, %v85_v3  ;;  %v157_v14 = vadd.f32 %v965_v5, %v86_v4  ;;  %v89_v15 = vmul.f32 %v958_v2, %v18_v10  ;;  %v158_v18 = vadd.f32 %v965_v5, %v87_v8  ;;  %v22_v22 = vld [vmem:[%s1375_s0 + $0x40] sm:$0xff]  ;;  %v25_v33 = vld [vmem:[%s1375_s0 + $0x58] sm:$0xff]  ;;  %v27_v39 = vld [vmem:[%s1375_s0 + $0x68] sm:$0xff] }
   0x6   :  { %v159_v19 = vadd.f32 %v965_v5, %v88_v9  ;;  %v161_v26 = vadd.f32 %v965_v5, %v90_v16  ;;  %v162_v30 = vadd.f32 %v965_v5, %v91_v20  ;;  %v163_v31 = vadd.f32 %v965_v5, %v92_v21  ;;  %v26_v38 = vld [vmem:[%s1375_s0 + $0x60] sm:$0xff]  ;;  %v28_v44 = vld [vmem:[%s1375_s0 + $0x70] sm:$0xff]  ;;  %v29_v49 = vld [vmem:[%s1375_s0 + $0x78] sm:$0xff] }
   0x7   :  { %v220_v23 = vmax.f32 %v156_v13, 0.0  ;;  %v221_v24 = vmax.f32 %v157_v14, 0.0  ;;  %v160_v25 = vadd.f32 %v965_v5, %v89_v15  ;;  %v222_v28 = vmax.f32 %v158_v18, 0.0  ;;  %v30_v54 = vld [vmem:[%s1375_s0 + $0x80] sm:$0xff]  ;;  %v31_v63 = vld [vmem:[%s1375_s0 + $0x88] sm:$0xff]  ;;  %v32_v6 = vld [vmem:[%s1375_s0 + $0x90] sm:$0xff] }
   0x8   :  { %v223_v29 = vmax.f32 %v159_v19, 0.0  ;;  %v225_v36 = vmax.f32 %v161_v26, 0.0  ;;  %v93_v37 = vmul.f32 %v958_v2, %v22_v22  ;;  %v226_v41 = vmax.f32 %v162_v30, 0.0  ;;  %v33_v7 = vld [vmem:[%s1375_s0 + $0x98] sm:$0xff]  ;;  %v34_v12 = vld [vmem:[%s1375_s0 + $0xa0] sm:$0xff]  ;;  %v35_v13 = vld [vmem:[%s1375_s0 + $0xa8] sm:$0xff] }
   0x9   :  { %v741_v34 = vpack.c.bf16 %v221_v24, %v220_v23  ;;  %v224_v35 = vmax.f32 %v160_v25, 0.0  ;;  %v227_v42 = vmax.f32 %v163_v31, 0.0  ;;  %v94_v43 = vmul.f32 %v958_v2, %v23_v27  ;;  %v36_v18 = vld [vmem:[%s1375_s0 + $0xb0] sm:$0xff]  ;;  %v37_v23 = vld [vmem:[%s1375_s0 + $0xb8] sm:$0xff] }
   0xa   :  { %v746_v40 = vpack.c.bf16 %v223_v29, %v222_v28  ;;  %v164_v46 = vadd.f32 %v965_v5, %v93_v37  ;;  %v95_v47 = vmul.f32 %v958_v2, %v24_v32  ;;  %v96_v48 = vmul.f32 %v958_v2, %v25_v33  ;;  %v38_v28 = vld [vmem:[%s1375_s0 + $0xc0] sm:$0xff]  ;;  %v39_v37 = vld [vmem:[%s1375_s0 + $0xc8] sm:$0xff] }
   0xb   :  { %742 = vst [vmem:[%s1378_s3] sm:$0xff] %v741_v34   ;;  %v751_v45 = vpack.c.bf16 %v225_v36, %v224_v35  ;;  %v756_v50 = vpack.c.bf16 %v227_v42, %v226_v41  ;;  %v165_v51 = vadd.f32 %v965_v5, %v94_v43  ;;  %v97_v52 = vmul.f32 %v958_v2, %v26_v38  ;;  %v40_v42 = vld [vmem:[%s1375_s0 + $0xd0] sm:$0xff]  ;;  %v41_v43 = vld [vmem:[%s1375_s0 + $0xd8] sm:$0xff] }
   0xc   :  { %898 = vst [vmem:[%s1378_s3 + $0x8] sm:$0xff] %v746_v40   ;;  %v98_v53 = vmul.f32 %v958_v2, %v27_v39  ;;  %v228_v55 = vmax.f32 %v164_v46, 0.0  ;;  %v166_v56 = vadd.f32 %v965_v5, %v95_v47  ;;  %v167_v57 = vadd.f32 %v965_v5, %v96_v48  ;;  %v42_v48 = vld [vmem:[%s1375_s0 + $0xe0] sm:$0xff] }
   0xd   :  { %899 = vst [vmem:[%s1378_s3 + $0x10] sm:$0xff] %v751_v45   ;;  %v99_v58 = vmul.f32 %v958_v2, %v28_v44  ;;  %900 = vst [vmem:[%s1378_s3 + $0x18] sm:$0xff] %v756_v50   ;;  %v229_v59 = vmax.f32 %v165_v51, 0.0  ;;  %v168_v60 = vadd.f32 %v965_v5, %v97_v52  ;;  %v100_v62 = vmul.f32 %v958_v2, %v29_v49  ;;  %v43_v49 = vld [vmem:[%s1375_s0 + $0xe8] sm:$0xff] }
   0xe   :  { %v169_v61 = vadd.f32 %v965_v5, %v98_v53  ;;  %v230_v0 = vmax.f32 %v166_v56, 0.0  ;;  %v231_v1 = vmax.f32 %v167_v57, 0.0  ;;  %v101_v4 = vmul.f32 %v958_v2, %v30_v54  ;;  %v44_v54 = vld [vmem:[%s1375_s0 + $0xf0] sm:$0xff] }
   0xf   :  { %v170_v3 = vadd.f32 %v965_v5, %v99_v58  ;;  %v761_v8 = vpack.c.bf16 %v229_v59, %v228_v55  ;;  %v232_v9 = vmax.f32 %v168_v60, 0.0  ;;  %v171_v11 = vadd.f32 %v965_v5, %v100_v62  ;;  %v45_v59 = vld [vmem:[%s1375_s0 + $0xf8] sm:$0xff] }
  0x10   :  { %v233_v10 = vmax.f32 %v169_v61, 0.0  ;;  %v766_v14 = vpack.c.bf16 %v231_v1, %v230_v0  ;;  %v102_v16 = vmul.f32 %v958_v2, %v31_v63  ;;  %v172_v17 = vadd.f32 %v965_v5, %v101_v4  ;;  %v46_v0 = vld [vmem:[%s1375_s0 + $0x100] sm:$0xff] }
  0x11   :  { %v234_v15 = vmax.f32 %v170_v3, 0.0  ;;  %901 = vst [vmem:[%s1378_s3 + $0x20] sm:$0xff] %v761_v8   ;;  %v235_v20 = vmax.f32 %v171_v11, 0.0  ;;  %v103_v21 = vmul.f32 %v958_v2, %v32_v6  ;;  %v104_v22 = vmul.f32 %v958_v2, %v33_v7  ;;  %v47_v11 = vld [vmem:[%s1375_s0 + $0x108] sm:$0xff] }
  0x12   :  { %v771_v19 = vpack.c.bf16 %v233_v10, %v232_v9  ;;  %902 = vst [vmem:[%s1378_s3 + $0x28] sm:$0xff] %v766_v14   ;;  %v173_v24 = vadd.f32 %v965_v5, %v102_v16  ;;  %v236_v25 = vmax.f32 %v172_v17, 0.0  ;;  %v105_v26 = vmul.f32 %v958_v2, %v34_v12  ;;  %v48_v16 = vld [vmem:[%s1375_s0 + $0x110] sm:$0xff]  ;;  %v49_v17 = vld [vmem:[%s1375_s0 + $0x118] sm:$0xff] }
  0x13   :  { %v106_v27 = vmul.f32 %v958_v2, %v35_v13  ;;  %v776_v29 = vpack.c.bf16 %v235_v20, %v234_v15  ;;  %v174_v30 = vadd.f32 %v965_v5, %v103_v21  ;;  %v175_v31 = vadd.f32 %v965_v5, %v104_v22  ;;  %v50_v22 = vld [vmem:[%s1375_s0 + $0x120] sm:$0xff] }
  0x14   :  { %903 = vst [vmem:[%s1378_s3 + $0x30] sm:$0xff] %v771_v19   ;;  %v107_v32 = vmul.f32 %v958_v2, %v36_v18  ;;  %v237_v33 = vmax.f32 %v173_v24, 0.0  ;;  %v176_v34 = vadd.f32 %v965_v5, %v105_v26  ;;  %v108_v36 = vmul.f32 %v958_v2, %v37_v23  ;;  %v51_v23 = vld [vmem:[%s1375_s0 + $0x128] sm:$0xff] }
  0x15   :  { %v177_v35 = vadd.f32 %v965_v5, %v106_v27  ;;  %904 = vst [vmem:[%s1378_s3 + $0x38] sm:$0xff] %v776_v29   ;;  %v238_v38 = vmax.f32 %v174_v30, 0.0  ;;  %v239_v39 = vmax.f32 %v175_v31, 0.0  ;;  %v109_v41 = vmul.f32 %v958_v2, %v38_v28  ;;  %v52_v28 = vld [vmem:[%s1375_s0 + $0x130] sm:$0xff] }
  0x16   :  { %v178_v40 = vadd.f32 %v965_v5, %v107_v32  ;;  %v781_v44 = vpack.c.bf16 %v237_v33, %v236_v25  ;;  %v240_v45 = vmax.f32 %v176_v34, 0.0  ;;  %v179_v47 = vadd.f32 %v965_v5, %v108_v36  ;;  %v53_v33 = vld [vmem:[%s1375_s0 + $0x138] sm:$0xff] }
  0x17   :  { %v241_v46 = vmax.f32 %v177_v35, 0.0  ;;  %v786_v50 = vpack.c.bf16 %v239_v39, %v238_v38  ;;  %v110_v52 = vmul.f32 %v958_v2, %v39_v37  ;;  %v180_v53 = vadd.f32 %v965_v5, %v109_v41  ;;  %v54_v38 = vld [vmem:[%s1375_s0 + $0x140] sm:$0xff] }
  0x18   :  { %v242_v51 = vmax.f32 %v178_v40, 0.0  ;;  %905 = vst [vmem:[%s1378_s3 + $0x40] sm:$0xff] %v781_v44   ;;  %v243_v56 = vmax.f32 %v179_v47, 0.0  ;;  %v111_v57 = vmul.f32 %v958_v2, %v40_v42  ;;  %v112_v58 = vmul.f32 %v958_v2, %v41_v43  ;;  %v55_v47 = vld [vmem:[%s1375_s0 + $0x148] sm:$0xff] }
  0x19   :  { %v791_v55 = vpack.c.bf16 %v241_v46, %v240_v45  ;;  %906 = vst [vmem:[%s1378_s3 + $0x48] sm:$0xff] %v786_v50   ;;  %v181_v60 = vadd.f32 %v965_v5, %v110_v52  ;;  %v244_v61 = vmax.f32 %v180_v53, 0.0  ;;  %v113_v62 = vmul.f32 %v958_v2, %v42_v48  ;;  %v56_v52 = vld [vmem:[%s1375_s0 + $0x150] sm:$0xff]  ;;  %v57_v53 = vld [vmem:[%s1375_s0 + $0x158] sm:$0xff] }
  0x1a   :  { %v114_v63 = vmul.f32 %v958_v2, %v43_v49  ;;  %v796_v1 = vpack.c.bf16 %v243_v56, %v242_v51  ;;  %v182_v3 = vadd.f32 %v965_v5, %v111_v57  ;;  %v183_v4 = vadd.f32 %v965_v5, %v112_v58  ;;  %v58_v58 = vld [vmem:[%s1375_s0 + $0x160] sm:$0xff] }
  0x1b   :  { %907 = vst [vmem:[%s1378_s3 + $0x50] sm:$0xff] %v791_v55   ;;  %v115_v6 = vmul.f32 %v958_v2, %v44_v54  ;;  %v245_v7 = vmax.f32 %v181_v60, 0.0  ;;  %v184_v8 = vadd.f32 %v965_v5, %v113_v62  ;;  %v116_v10 = vmul.f32 %v958_v2, %v45_v59  ;;  %v59_v59 = vld [vmem:[%s1375_s0 + $0x168] sm:$0xff] }
  0x1c   :  { %v185_v9 = vadd.f32 %v965_v5, %v114_v63  ;;  %908 = vst [vmem:[%s1378_s3 + $0x58] sm:$0xff] %v796_v1   ;;  %v246_v12 = vmax.f32 %v182_v3, 0.0  ;;  %v247_v13 = vmax.f32 %v183_v4, 0.0  ;;  %v117_v15 = vmul.f32 %v958_v2, %v46_v0  ;;  %v60_v0 = vld [vmem:[%s1375_s0 + $0x170] sm:$0xff] }
  0x1d   :  { %v186_v14 = vadd.f32 %v965_v5, %v115_v6  ;;  %v801_v18 = vpack.c.bf16 %v245_v7, %v244_v61  ;;  %v248_v19 = vmax.f32 %v184_v8, 0.0  ;;  %v187_v21 = vadd.f32 %v965_v5, %v116_v10  ;;  %v61_v7 = vld [vmem:[%s1375_s0 + $0x178] sm:$0xff] }
  0x1e   :  { %v249_v20 = vmax.f32 %v185_v9, 0.0  ;;  %v806_v24 = vpack.c.bf16 %v247_v13, %v246_v12  ;;  %v118_v26 = vmul.f32 %v958_v2, %v47_v11  ;;  %v188_v27 = vadd.f32 %v965_v5, %v117_v15  ;;  %v62_v12 = vld [vmem:[%s1375_s0 + $0x180] sm:$0xff] }
  0x1f   :  { %v250_v25 = vmax.f32 %v186_v14, 0.0  ;;  %909 = vst [vmem:[%s1378_s3 + $0x60] sm:$0xff] %v801_v18   ;;  %v251_v30 = vmax.f32 %v187_v21, 0.0  ;;  %v119_v31 = vmul.f32 %v958_v2, %v48_v16  ;;  %v120_v32 = vmul.f32 %v958_v2, %v49_v17  ;;  %v63_v21 = vld [vmem:[%s1375_s0 + $0x188] sm:$0xff] }
  0x20   :  { %v811_v29 = vpack.c.bf16 %v249_v20, %v248_v19  ;;  %910 = vst [vmem:[%s1378_s3 + $0x68] sm:$0xff] %v806_v24   ;;  %v189_v34 = vadd.f32 %v965_v5, %v118_v26  ;;  %v252_v35 = vmax.f32 %v188_v27, 0.0  ;;  %v121_v36 = vmul.f32 %v958_v2, %v50_v22  ;;  %v64_v26 = vld [vmem:[%s1375_s0 + $0x190] sm:$0xff]  ;;  %v65_v27 = vld [vmem:[%s1375_s0 + $0x198] sm:$0xff] }
  0x21   :  { %v122_v37 = vmul.f32 %v958_v2, %v51_v23  ;;  %v816_v39 = vpack.c.bf16 %v251_v30, %v250_v25  ;;  %v190_v40 = vadd.f32 %v965_v5, %v119_v31  ;;  %v191_v41 = vadd.f32 %v965_v5, %v120_v32  ;;  %v66_v32 = vld [vmem:[%s1375_s0 + $0x1a0] sm:$0xff] }
  0x22   :  { %911 = vst [vmem:[%s1378_s3 + $0x70] sm:$0xff] %v811_v29   ;;  %v123_v42 = vmul.f32 %v958_v2, %v52_v28  ;;  %v253_v43 = vmax.f32 %v189_v34, 0.0  ;;  %v192_v44 = vadd.f32 %v965_v5, %v121_v36  ;;  %v124_v46 = vmul.f32 %v958_v2, %v53_v33  ;;  %v67_v33 = vld [vmem:[%s1375_s0 + $0x1a8] sm:$0xff] }
  0x23   :  { %v193_v45 = vadd.f32 %v965_v5, %v122_v37  ;;  %912 = vst [vmem:[%s1378_s3 + $0x78] sm:$0xff] %v816_v39   ;;  %v254_v48 = vmax.f32 %v190_v40, 0.0  ;;  %v255_v49 = vmax.f32 %v191_v41, 0.0  ;;  %v125_v51 = vmul.f32 %v958_v2, %v54_v38  ;;  %v68_v38 = vld [vmem:[%s1375_s0 + $0x1b0] sm:$0xff] }
  0x24   :  { %v194_v50 = vadd.f32 %v965_v5, %v123_v42  ;;  %v821_v54 = vpack.c.bf16 %v253_v43, %v252_v35  ;;  %v256_v55 = vmax.f32 %v192_v44, 0.0  ;;  %v195_v57 = vadd.f32 %v965_v5, %v124_v46  ;;  %v69_v43 = vld [vmem:[%s1375_s0 + $0x1b8] sm:$0xff] }
  0x25   :  { %v257_v56 = vmax.f32 %v193_v45, 0.0  ;;  %v826_v60 = vpack.c.bf16 %v255_v49, %v254_v48  ;;  %v126_v62 = vmul.f32 %v958_v2, %v55_v47  ;;  %v196_v63 = vadd.f32 %v965_v5, %v125_v51  ;;  %v70_v48 = vld [vmem:[%s1375_s0 + $0x1c0] sm:$0xff] }
  0x26   :  { %v258_v61 = vmax.f32 %v194_v50, 0.0  ;;  %913 = vst [vmem:[%s1378_s3 + $0x80] sm:$0xff] %v821_v54   ;;  %v259_v3 = vmax.f32 %v195_v57, 0.0  ;;  %v127_v4 = vmul.f32 %v958_v2, %v56_v52  ;;  %v128_v6 = vmul.f32 %v958_v2, %v57_v53  ;;  %v71_v57 = vld [vmem:[%s1375_s0 + $0x1c8] sm:$0xff] }
  0x27   :  { %v831_v1 = vpack.c.bf16 %v257_v56, %v256_v55  ;;  %914 = vst [vmem:[%s1378_s3 + $0x88] sm:$0xff] %v826_v60   ;;  %v197_v8 = vadd.f32 %v965_v5, %v126_v62  ;;  %v260_v9 = vmax.f32 %v196_v63, 0.0  ;;  %v129_v10 = vmul.f32 %v958_v2, %v58_v58  ;;  %v72_v62 = vld [vmem:[%s1375_s0 + $0x1d0] sm:$0xff]  ;;  %v73_v63 = vld [vmem:[%s1375_s0 + $0x1d8] sm:$0xff] }
  0x28   :  { %v130_v11 = vmul.f32 %v958_v2, %v59_v59  ;;  %v836_v13 = vpack.c.bf16 %v259_v3, %v258_v61  ;;  %v198_v14 = vadd.f32 %v965_v5, %v127_v4  ;;  %v199_v15 = vadd.f32 %v965_v5, %v128_v6  ;;  %v74_v6 = vld [vmem:[%s1375_s0 + $0x1e0] sm:$0xff] }
  0x29   :  { %915 = vst [vmem:[%s1378_s3 + $0x90] sm:$0xff] %v831_v1   ;;  %v131_v16 = vmul.f32 %v958_v2, %v60_v0  ;;  %v261_v17 = vmax.f32 %v197_v8, 0.0  ;;  %v200_v18 = vadd.f32 %v965_v5, %v129_v10  ;;  %v132_v20 = vmul.f32 %v958_v2, %v61_v7  ;;  %v75_v7 = vld [vmem:[%s1375_s0 + $0x1e8] sm:$0xff] }
  0x2a   :  { %v201_v19 = vadd.f32 %v965_v5, %v130_v11  ;;  %916 = vst [vmem:[%s1378_s3 + $0x98] sm:$0xff] %v836_v13   ;;  %v262_v22 = vmax.f32 %v198_v14, 0.0  ;;  %v263_v23 = vmax.f32 %v199_v15, 0.0  ;;  %v133_v25 = vmul.f32 %v958_v2, %v62_v12  ;;  %v76_v12 = vld [vmem:[%s1375_s0 + $0x1f0] sm:$0xff] }
  0x2b   :  { %v202_v24 = vadd.f32 %v965_v5, %v131_v16  ;;  %v841_v28 = vpack.c.bf16 %v261_v17, %v260_v9  ;;  %v264_v29 = vmax.f32 %v200_v18, 0.0  ;;  %v203_v31 = vadd.f32 %v965_v5, %v132_v20  ;;  %v77_v17 = vld [vmem:[%s1375_s0 + $0x1f8] sm:$0xff] }
  0x2c   :  { %v265_v30 = vmax.f32 %v201_v19, 0.0  ;;  %v846_v34 = vpack.c.bf16 %v263_v23, %v262_v22  ;;  %v134_v36 = vmul.f32 %v958_v2, %v63_v21  ;;  %v204_v37 = vadd.f32 %v965_v5, %v133_v25 }
  0x2d   :  { %v266_v35 = vmax.f32 %v202_v24, 0.0  ;;  %917 = vst [vmem:[%s1378_s3 + $0xa0] sm:$0xff] %v841_v28   ;;  %v267_v40 = vmax.f32 %v203_v31, 0.0  ;;  %v135_v41 = vmul.f32 %v958_v2, %v64_v26  ;;  %v136_v42 = vmul.f32 %v958_v2, %v65_v27 }
  0x2e   :  { %v851_v39 = vpack.c.bf16 %v265_v30, %v264_v29  ;;  %918 = vst [vmem:[%s1378_s3 + $0xa8] sm:$0xff] %v846_v34   ;;  %v205_v44 = vadd.f32 %v965_v5, %v134_v36  ;;  %v268_v45 = vmax.f32 %v204_v37, 0.0  ;;  %v137_v46 = vmul.f32 %v958_v2, %v66_v32 }
  0x2f   :  { %v138_v47 = vmul.f32 %v958_v2, %v67_v33  ;;  %v856_v49 = vpack.c.bf16 %v267_v40, %v266_v35  ;;  %v206_v50 = vadd.f32 %v965_v5, %v135_v41  ;;  %v207_v51 = vadd.f32 %v965_v5, %v136_v42 }
  0x30   :  { %919 = vst [vmem:[%s1378_s3 + $0xb0] sm:$0xff] %v851_v39   ;;  %v139_v52 = vmul.f32 %v958_v2, %v68_v38  ;;  %v269_v53 = vmax.f32 %v205_v44, 0.0  ;;  %v208_v54 = vadd.f32 %v965_v5, %v137_v46  ;;  %v140_v56 = vmul.f32 %v958_v2, %v69_v43 }
  0x31   :  { %v209_v55 = vadd.f32 %v965_v5, %v138_v47  ;;  %920 = vst [vmem:[%s1378_s3 + $0xb8] sm:$0xff] %v856_v49   ;;  %v270_v58 = vmax.f32 %v206_v50, 0.0  ;;  %v271_v59 = vmax.f32 %v207_v51, 0.0  ;;  %v141_v61 = vmul.f32 %v958_v2, %v70_v48 }
  0x32   :  { %v210_v60 = vadd.f32 %v965_v5, %v139_v52  ;;  %v861_v0 = vpack.c.bf16 %v269_v53, %v268_v45  ;;  %v272_v1 = vmax.f32 %v208_v54, 0.0  ;;  %v211_v4 = vadd.f32 %v965_v5, %v140_v56 }
  0x33   :  { %v273_v3 = vmax.f32 %v209_v55, 0.0  ;;  %v866_v8 = vpack.c.bf16 %v271_v59, %v270_v58  ;;  %v142_v10 = vmul.f32 %v958_v2, %v71_v57  ;;  %v212_v11 = vadd.f32 %v965_v5, %v141_v61 }
  0x34   :  { %v274_v9 = vmax.f32 %v210_v60, 0.0  ;;  %921 = vst [vmem:[%s1378_s3 + $0xc0] sm:$0xff] %v861_v0   ;;  %v275_v14 = vmax.f32 %v211_v4, 0.0  ;;  %v143_v15 = vmul.f32 %v958_v2, %v72_v62  ;;  %v144_v16 = vmul.f32 %v958_v2, %v73_v63 }
  0x35   :  { %v871_v13 = vpack.c.bf16 %v273_v3, %v272_v1  ;;  %922 = vst [vmem:[%s1378_s3 + $0xc8] sm:$0xff] %v866_v8   ;;  %v213_v18 = vadd.f32 %v965_v5, %v142_v10  ;;  %v276_v19 = vmax.f32 %v212_v11, 0.0  ;;  %v145_v20 = vmul.f32 %v958_v2, %v74_v6 }
  0x36   :  { %v146_v21 = vmul.f32 %v958_v2, %v75_v7  ;;  %v876_v22 = vpack.c.bf16 %v275_v14, %v274_v9  ;;  %v214_v23 = vadd.f32 %v965_v5, %v143_v15  ;;  %v215_v24 = vadd.f32 %v965_v5, %v144_v16 }
  0x37   :  { %923 = vst [vmem:[%s1378_s3 + $0xd0] sm:$0xff] %v871_v13   ;;  %v147_v25 = vmul.f32 %v958_v2, %v76_v12  ;;  %v277_v26 = vmax.f32 %v213_v18, 0.0  ;;  %v216_v27 = vadd.f32 %v965_v5, %v145_v20  ;;  %v148_v29 = vmul.f32 %v958_v2, %v77_v17 }
  0x38   :  { %v217_v28 = vadd.f32 %v965_v5, %v146_v21  ;;  %924 = vst [vmem:[%s1378_s3 + $0xd8] sm:$0xff] %v876_v22   ;;  %v278_v30 = vmax.f32 %v214_v23, 0.0  ;;  %v279_v31 = vmax.f32 %v215_v24, 0.0 }
  0x39   :  { %v218_v32 = vadd.f32 %v965_v5, %v147_v25  ;;  %v881_v33 = vpack.c.bf16 %v277_v26, %v276_v19  ;;  %v280_v34 = vmax.f32 %v216_v27, 0.0  ;;  %v219_v36 = vadd.f32 %v965_v5, %v148_v29 }
  0x3a   :  { %v281_v35 = vmax.f32 %v217_v28, 0.0  ;;  %v886_v37 = vpack.c.bf16 %v279_v31, %v278_v30 }
  0x3b   :  { %v282_v38 = vmax.f32 %v218_v32, 0.0  ;;  %925 = vst [vmem:[%s1378_s3 + $0xe0] sm:$0xff] %v881_v33   ;;  %v283_v39 = vmax.f32 %v219_v36, 0.0 }
  0x3c   :  { %v891_v2 = vpack.c.bf16 %v281_v35, %v280_v34  ;;  %926 = vst [vmem:[%s1378_s3 + $0xe8] sm:$0xff] %v886_v37  }
  0x3d   :  { %v896_v40 = vpack.c.bf16 %v283_v39, %v282_v38 }
  0x3e   :  { %927 = vst [vmem:[%s1378_s3 + $0xf0] sm:$0xff] %v891_v2  }
  0x3f   :  { %928 = vst [vmem:[%s1378_s3 + $0xf8] sm:$0xff] %v896_v40  }

// kernel: basic_block_forward.4
= control target key start
LH: loop header
LB: loop body
LE: loop exit
PB: predicated region body
PF: predicated region fallthrough
CT: control target
= control target key end

     0   :  { %s1283_s12 = smov 0   ;;  %s1285_s13 = smov 0   ;;  %s1488_s0 = inlined_call_operand.vmem [shape: bf16[512,128], index: 0, kind: input, shape index: {}]   ;;  %s1489_s1 = inlined_call_operand.vmem [shape: bf16[128,128], index: 1, kind: input, shape index: {}]   ;;  %s1490_s2 = inlined_call_operand.vmem [shape: f32[512,128], index: 2, kind: output, shape index: {0}]   ;;  %s1491_s3 = inlined_call_operand.vmem [shape: f32[2,2,128], index: 3, kind: output, shape index: {1}]  }
   0x1   :  { %s1287_s14 = smov 0  }
   0x2 LB: > { %s33_s15 = sadd.s32 1, %s1257_s13  ;;  %p1071_p0 = scmp.ge.s32.totalorder %s1261_s14, 1  ;;  %s1261_s14 = sphi %s1287_s14, %s14_s14   ;;  %s1257_s13 = sphi %s1285_s13, %s1493_s13   ;;  %s1253_s12 = sphi %s1283_s12, %s1492_s12  }
   0x3   : > { %p35_p1 = scmp.ge.s32.totalorder %s33_s15, 2  ;;  %p185_p2 = scmp.lt.s32.totalorder %s1261_s14, 3 }
   0x5   : > { %s1495_s15 = smov (%p35_p1, %s33_s15), 0  ;;  %p186_p3 = pnand %p1071_p0, %p185_p2 }
   0x6   : > { %s1072_s18 = sshll.u32 (!%p186_p3), %s1253_s12, 5  ;;  %p257_p5 = scmp.lt.s32.totalorder (!%p186_p3), %s1253_s12, 1 }
   0x7   : > { %189 = sbr.rel (%p186_p3) target bundleno = 322 (0x142), region = 28  ;;  %p231_p4 = scmp.lt.s32.totalorder (!%p186_p3), %s1072_s18, 63 }
   0xc   : > { %v1215_v0 = vld [vmem:[%s1489_s1 + $0x38] sm:$0xff]   ;;  %v1216_v1 = vld [vmem:[%s1489_s1 + $0x30] sm:$0xff]   ;;  %s1497_s18 = smov (!%p231_p4, %s1072_s18), 63  ;;  %v1217_v2 = vld [vmem:[%s1489_s1 + $0x28] sm:$0xff]   ;;  %s1499_s12 = smov (!%p257_p5, %s1253_s12), 1  ;;  %vm923_vm0 = vcmask 1040384  }
   0xd   : > { %1127 = vmatprep.subr.bf16.mxu0 %v1215_v0  ;;  %1175 = vmatprep.subr.bf16.mxu1 %v1215_v0  ;;  %s1073_s23 = sshll.u32 %s1497_s18, 2  ;;  %v1218_v3 = vld [vmem:[%s1489_s1 + $0x20] sm:$0xff]   ;;  %v1219_v5 = vld [vmem:[%s1489_s1 + $0x18] sm:$0xff]   ;;  %v1220_v6 = vld [vmem:[%s1489_s1 + $0x10] sm:$0xff]   ;;  %s1075_s10 = sshll.u32 %s1497_s18, 3 }
   0xe   : > { %1128 = vmatpush3.bf16.msra.mxu0 %v1215_v0  ;;  %1183 = vmatpush3.bf16.msra.mxu1 %v1215_v0  ;;  %s1319_s26 = scalar_lea.vmem %s1488_s0, %s1073_s23  ;;  %v1221_v8 = vld [vmem:[%s1489_s1 + $0x8] sm:$0xff]   ;;  %v1222_v9 = vld [vmem:[%s1489_s1] sm:$0xff]   ;;  %s1356_s17 = scalar_lea.vmem %s1490_s2, %s1075_s10 }
   0xf   : > { %1129 = vmatprep.subr.bf16.mxu0 %v1216_v1  ;;  %1176 = vmatprep.subr.bf16.mxu1 %v1216_v1  ;;  %v1223_v4 = vld [vmem:[%s1319_s26] sm:$0xff]   ;;  %v1224_v10 = vld [vmem:[%s1319_s26 + $0x8] sm:$0xff]   ;;  %v1225_v12 = vld [vmem:[%s1319_s26 + $0x10] sm:$0xff]   ;;  %s1076_s18 = sshll.u32 %s1499_s12, 1 }
  0x10   : > { %1143 = vmatprep.mubr.bf16.mxu0 %v1223_v4  ;;  %v1231_v7 = vld [vmem:[%s1319_s26 + $0x40] sm:$0xff]   ;;  %v1232_v11 = vld [vmem:[%s1319_s26 + $0x48] sm:$0xff]   ;;  %v1233_v13 = vld [vmem:[%s1319_s26 + $0x50] sm:$0xff]   ;;  %s263_s21 = scalar_lea.vmem %s1491_s3, %s1076_s18 }
  0x11   : > { %1159 = vmatprep.mubr.bf16.mxu1 %v1231_v7  ;;  %v1226_v14 = vld [vmem:[%s1319_s26 + $0x18] sm:$0xff]   ;;  %v1227_v16 = vld [vmem:[%s1319_s26 + $0x20] sm:$0xff]   ;;  %v1228_v18 = vld [vmem:[%s1319_s26 + $0x28] sm:$0xff]  }
  0x12   : > { %1130 = vmatpush3.bf16.msra.mxu0 %v1216_v1  ;;  %1184 = vmatpush3.bf16.msra.mxu1 %v1216_v1  ;;  %v1234_v15 = vld [vmem:[%s1319_s26 + $0x58] sm:$0xff]   ;;  %v1235_v17 = vld [vmem:[%s1319_s26 + $0x60] sm:$0xff]   ;;  %v1236_v19 = vld [vmem:[%s1319_s26 + $0x68] sm:$0xff]  }
  0x13   : > { %1131 = vmatprep.subr.bf16.mxu0 %v1217_v2  ;;  %1177 = vmatprep.subr.bf16.mxu1 %v1217_v2  ;;  %v1229_v20 = vld [vmem:[%s1319_s26 + $0x30] sm:$0xff]   ;;  %v1230_v22 = vld [vmem:[%s1319_s26 + $0x38] sm:$0xff]  }
  0x14   : > { %v1237_v21 = vld [vmem:[%s1319_s26 + $0x70] sm:$0xff]   ;;  %v1238_v23 = vld [vmem:[%s1319_s26 + $0x78] sm:$0xff]  }
  0x16   : > { %1132 = vmatpush3.bf16.msra.mxu0 %v1217_v2  ;;  %1185 = vmatpush3.bf16.msra.mxu1 %v1217_v2 }
  0x17   : > { %1133 = vmatprep.subr.bf16.mxu0 %v1218_v3  ;;  %1178 = vmatprep.subr.bf16.mxu1 %v1218_v3 }
  0x1a   : > { %1134 = vmatpush3.bf16.msra.mxu0 %v1218_v3  ;;  %1186 = vmatpush3.bf16.msra.mxu1 %v1218_v3 }
  0x1b   : > { %1135 = vmatprep.subr.bf16.mxu0 %v1219_v5  ;;  %1179 = vmatprep.subr.bf16.mxu1 %v1219_v5 }
  0x1e   : > { %1136 = vmatpush3.bf16.msra.mxu0 %v1219_v5  ;;  %1187 = vmatpush3.bf16.msra.mxu1 %v1219_v5 }
  0x1f   : > { %1137 = vmatprep.subr.bf16.mxu0 %v1220_v6  ;;  %1180 = vmatprep.subr.bf16.mxu1 %v1220_v6 }
  0x22   : > { %1138 = vmatpush3.bf16.msra.mxu0 %v1220_v6  ;;  %1188 = vmatpush3.bf16.msra.mxu1 %v1220_v6 }
  0x23   : > { %1139 = vmatprep.subr.bf16.mxu0 %v1221_v8  ;;  %1181 = vmatprep.subr.bf16.mxu1 %v1221_v8 }
  0x26   : > { %1140 = vmatpush3.bf16.msra.mxu0 %v1221_v8  ;;  %1189 = vmatpush3.bf16.msra.mxu1 %v1221_v8 }
  0x27   : > { %1141 = vmatprep.subr.bf16.mxu0 %v1222_v9  ;;  %1182 = vmatprep.subr.bf16.mxu1 %v1222_v9 }
  0x2a   : > { %1142 = vmatpush3.bf16.msra.mxu0 %v1222_v9  ;;  %1190 = vmatpush3.bf16.msra.mxu1 %v1222_v9 }
  0x2d   : > { %1144 = vmatmul.mubr.bf16.vlgmr.msra.gmra.mxu0 %v1224_v10  ;;  %1160 = vmatmul.mubr.bf16.vlgmr.msra.gmra.mxu1 %v1232_v11 }
  0x2e   : > { %1147 = vmatprep.mubr.bf16.mxu0 %v1225_v12  ;;  %1163 = vmatprep.mubr.bf16.mxu1 %v1233_v13 }
  0x35   : > { %1148 = vmatmul.mubr.bf16.gmra.mxu0 %v1226_v14  ;;  %1164 = vmatmul.mubr.bf16.gmra.mxu1 %v1234_v15 }
  0x36   : > { %1151 = vmatprep.mubr.bf16.mxu0 %v1227_v16  ;;  %1167 = vmatprep.mubr.bf16.mxu1 %v1235_v17 }
  0x3d   : > { %1152 = vmatmul.mubr.bf16.gmra.mxu0 %v1228_v18  ;;  %1168 = vmatmul.mubr.bf16.gmra.mxu1 %v1236_v19 }
  0x3e   : > { %1155 = vmatprep.mubr.bf16.mxu0 %v1229_v20  ;;  %1171 = vmatprep.mubr.bf16.mxu1 %v1237_v21 }
  0x45   : > { %1156 = vmatmul.mubr.bf16.gmra.mxu0 %v1230_v22  ;;  %1172 = vmatmul.mubr.bf16.gmra.mxu1 %v1238_v23 }
  0xed   : > { %v1145_v24 = vpop.f32.mrf.mxu0  ;;  %v1358_v25 = vpop.f32.mrf.mxu1 }
  0xee   : > { %787 = vst [vmem:[%s1356_s17 + $0x10] sm:$0xff] %v1145_v24  ;;  %803 = vst [vmem:[%s1356_s17 + $0x90] sm:$0xff] %v1358_v25  ;;  %v856_v37 = vmul.f32 %v1145_v24, %v1145_v24 }
  0xef   : > { %v559_v26 = vpop.f32.mrf.mxu0  ;;  %v1363_v27 = vpop.f32.mrf.mxu1 }
  0xf0   : > { %785 = vst [vmem:[%s1356_s17] sm:$0xff] %v559_v26  ;;  %801 = vst [vmem:[%s1356_s17 + $0x80] sm:$0xff] %v1363_v27  ;;  %v854_v32 = vmul.f32 %v559_v26, %v559_v26 }
  0xf1   : > { %v1146_v28 = vpop.f32.mrf.mxu0  ;;  %v1368_v29 = vpop.f32.mrf.mxu1 }
  0xf2   : > { %788 = vst [vmem:[%s1356_s17 + $0x18] sm:$0xff] %v1146_v28  ;;  %804 = vst [vmem:[%s1356_s17 + $0x98] sm:$0xff] %v1368_v29  ;;  %v857_v42 = vmul.f32 %v1146_v28, %v1146_v28 }
  0xf3   : > { %v562_v30 = vpop.f32.mrf.mxu0  ;;  %v1373_v31 = vpop.f32.mrf.mxu1 }
  0xf4   : > { %786 = vst [vmem:[%s1356_s17 + $0x8] sm:$0xff] %v562_v30  ;;  %v817_v33 = vadd.f32 %v562_v30, %v559_v26  ;;  %v855_v34 = vmul.f32 %v562_v30, %v562_v30  ;;  %802 = vst [vmem:[%s1356_s17 + $0x88] sm:$0xff] %v1373_v31 }
  0xf5   : > { %v1149_v35 = vpop.f32.mrf.mxu0  ;;  %v1378_v36 = vpop.f32.mrf.mxu1 }
  0xf6   : > { %v818_v38 = vadd.f32 %v1145_v24, %v817_v33  ;;  %v886_v39 = vadd.f32 %v855_v34, %v854_v32  ;;  %791 = vst [vmem:[%s1356_s17 + $0x30] sm:$0xff] %v1149_v35  ;;  %807 = vst [vmem:[%s1356_s17 + $0xb0] sm:$0xff] %v1378_v36  ;;  %v860_v57 = vmul.f32 %v1149_v35, %v1149_v35 }
  0xf7   : > { %v575_v40 = vpop.f32.mrf.mxu0  ;;  %v1383_v41 = vpop.f32.mrf.mxu1 }
  0xf8   : > { %v887_v43 = vadd.f32 %v886_v39, %v856_v37  ;;  %789 = vst [vmem:[%s1356_s17 + $0x20] sm:$0xff] %v575_v40  ;;  %v819_v44 = vadd.f32 %v1146_v28, %v818_v38  ;;  %805 = vst [vmem:[%s1356_s17 + $0xa0] sm:$0xff] %v1383_v41  ;;  %v858_v48 = vmul.f32 %v575_v40, %v575_v40 }
  0xf9   : > { %v1150_v45 = vpop.f32.mrf.mxu0  ;;  %v1388_v46 = vpop.f32.mrf.mxu1 }
  0xfa   : > { %v820_v47 = vadd.f32 %v819_v44, %v575_v40  ;;  %v888_v49 = vadd.f32 %v887_v43, %v857_v42  ;;  %792 = vst [vmem:[%s1356_s17 + $0x38] sm:$0xff] %v1150_v45  ;;  %808 = vst [vmem:[%s1356_s17 + $0xb8] sm:$0xff] %v1388_v46  ;;  %v861_v62 = vmul.f32 %v1150_v45, %v1150_v45 }
  0xfb   : > { %v578_v50 = vpop.f32.mrf.mxu0  ;;  %v1393_v51 = vpop.f32.mrf.mxu1  ;;  %v870_v43 = vmul.f32 %v1363_v27, %v1363_v27 }
  0xfc   : > { %v889_v52 = vadd.f32 %v888_v49, %v858_v48  ;;  %790 = vst [vmem:[%s1356_s17 + $0x28] sm:$0xff] %v578_v50  ;;  %v821_v53 = vadd.f32 %v820_v47, %v578_v50  ;;  %v859_v54 = vmul.f32 %v578_v50, %v578_v50  ;;  %806 = vst [vmem:[%s1356_s17 + $0xa8] sm:$0xff] %v1393_v51 }
  0xfd   : > { %v1153_v55 = vpop.f32.mrf.mxu0  ;;  %v1398_v56 = vpop.f32.mrf.mxu1  ;;  %v871_v48 = vmul.f32 %v1373_v31, %v1373_v31  ;;  %v872_v50 = vmul.f32 %v1358_v25, %v1358_v25 }
  0xfe   : > { %v822_v58 = vadd.f32 %v1149_v35, %v821_v53  ;;  %v890_v59 = vadd.f32 %v889_v52, %v859_v54  ;;  %795 = vst [vmem:[%s1356_s17 + $0x50] sm:$0xff] %v1153_v55  ;;  %811 = vst [vmem:[%s1356_s17 + $0xd0] sm:$0xff] %v1398_v56  ;;  %v864_v13 = vmul.f32 %v1153_v55, %v1153_v55 }
  0xff   : > { %v591_v60 = vpop.f32.mrf.mxu0  ;;  %v1403_v61 = vpop.f32.mrf.mxu1  ;;  %v873_v54 = vmul.f32 %v1368_v29, %v1368_v29 }
 0x100   : > { %v891_v63 = vadd.f32 %v890_v59, %v860_v57  ;;  %793 = vst [vmem:[%s1356_s17 + $0x40] sm:$0xff] %v591_v60  ;;  %v823_v0 = vadd.f32 %v1150_v45, %v822_v58  ;;  %809 = vst [vmem:[%s1356_s17 + $0xc0] sm:$0xff] %v1403_v61  ;;  %v862_v4 = vmul.f32 %v591_v60, %v591_v60 }
 0x101   : > { %v1154_v1 = vpop.f32.mrf.mxu0  ;;  %v1408_v2 = vpop.f32.mrf.mxu1  ;;  %v874_v58 = vmul.f32 %v1383_v41, %v1383_v41 }
 0x102   : > { %v824_v3 = vadd.f32 %v823_v0, %v591_v60  ;;  %v892_v5 = vadd.f32 %v891_v63, %v861_v62  ;;  %796 = vst [vmem:[%s1356_s17 + $0x58] sm:$0xff] %v1154_v1  ;;  %812 = vst [vmem:[%s1356_s17 + $0xd8] sm:$0xff] %v1408_v2  ;;  %v865_v18 = vmul.f32 %v1154_v1, %v1154_v1 }
 0x103   : > { %v594_v6 = vpop.f32.mrf.mxu0  ;;  %v1413_v7 = vpop.f32.mrf.mxu1  ;;  %v875_v62 = vmul.f32 %v1393_v51, %v1393_v51 }
 0x104   : > { %v893_v8 = vadd.f32 %v892_v5, %v862_v4  ;;  %794 = vst [vmem:[%s1356_s17 + $0x48] sm:$0xff] %v594_v6  ;;  %v825_v9 = vadd.f32 %v824_v3, %v594_v6  ;;  %v863_v10 = vmul.f32 %v594_v6, %v594_v6  ;;  %810 = vst [vmem:[%s1356_s17 + $0xc8] sm:$0xff] %v1413_v7 }
 0x105   : > { %v1157_v11 = vpop.f32.mrf.mxu0  ;;  %v1418_v12 = vpop.f32.mrf.mxu1  ;;  %v878_v4 = vmul.f32 %v1403_v61, %v1403_v61 }
 0x106   : > { %v826_v14 = vadd.f32 %v1153_v55, %v825_v9  ;;  %v894_v15 = vadd.f32 %v893_v8, %v863_v10  ;;  %799 = vst [vmem:[%s1356_s17 + $0x70] sm:$0xff] %v1157_v11  ;;  %815 = vst [vmem:[%s1356_s17 + $0xf0] sm:$0xff] %v1418_v12  ;;  %v868_v35 = vmul.f32 %v1157_v11, %v1157_v11 }
 0x107   : > { %v607_v16 = vpop.f32.mrf.mxu0  ;;  %v671_v17 = vpop.f32.mrf.mxu1  ;;  %v879_v8 = vmul.f32 %v1413_v7, %v1413_v7 }
 0x108   : > { %v895_v19 = vadd.f32 %v894_v15, %v864_v13  ;;  %797 = vst [vmem:[%s1356_s17 + $0x60] sm:$0xff] %v607_v16  ;;  %v827_v20 = vadd.f32 %v1154_v1, %v826_v14  ;;  %813 = vst [vmem:[%s1356_s17 + $0xe0] sm:$0xff] %v671_v17  ;;  %v866_v24 = vmul.f32 %v607_v16, %v607_v16 }
 0x109   : > { %v1158_v21 = vpop.f32.mrf.mxu0  ;;  %v1425_v22 = vpop.f32.mrf.mxu1  ;;  %v882_v14 = vmul.f32 %v671_v17, %v671_v17 }
 0x10a   : > { %v828_v23 = vadd.f32 %v827_v20, %v607_v16  ;;  %v896_v26 = vadd.f32 %v895_v19, %v865_v18  ;;  %800 = vst [vmem:[%s1356_s17 + $0x78] sm:$0xff] %v1158_v21  ;;  %816 = vst [vmem:[%s1356_s17 + $0xf8] sm:$0xff] %v1425_v22  ;;  %v869_v39 = vmul.f32 %v1158_v21, %v1158_v21 }
 0x10b   : > { %v610_v28 = vpop.f32.mrf.mxu0  ;;  %v674_v30 = vpop.f32.mrf.mxu1  ;;  %v884_v19 = vmul.f32 %v1418_v12, %v1418_v12 }
 0x10c   : > { %v897_v32 = vadd.f32 %v896_v26, %v866_v24  ;;  %798 = vst [vmem:[%s1356_s17 + $0x68] sm:$0xff] %v610_v28  ;;  %v829_v33 = vadd.f32 %v828_v23, %v610_v28  ;;  %v867_v34 = vmul.f32 %v610_v28, %v610_v28  ;;  %814 = vst [vmem:[%s1356_s17 + $0xe8] sm:$0xff] %v674_v30 }
 0x10e   : > { %v830_v37 = vadd.f32 %v1157_v11, %v829_v33  ;;  %v898_v38 = vadd.f32 %v897_v32, %v867_v34 }
 0x110   : > { %v831_v40 = vadd.f32 %v1158_v21, %v830_v37  ;;  %v899_v42 = vadd.f32 %v898_v38, %v868_v35  ;;  %v885_v21 = vmul.f32 %v1425_v22, %v1425_v22 }
 0x112   : > { %v900_v44 = vadd.f32 %v899_v42, %v869_v39  ;;  %v832_v45 = vadd.f32 %v831_v40, %v1363_v27 }
 0x114   : > { %v833_v47 = vadd.f32 %v832_v45, %v1373_v31  ;;  %v901_v49 = vadd.f32 %v900_v44, %v870_v43 }
 0x116   : > { %v834_v52 = vadd.f32 %v1358_v25, %v833_v47  ;;  %v902_v53 = vadd.f32 %v901_v49, %v871_v48  ;;  %v876_v25 = vmul.f32 %v1378_v36, %v1378_v36 }
 0x118   : > { %v903_v55 = vadd.f32 %v902_v53, %v872_v50  ;;  %v835_v57 = vadd.f32 %v1368_v29, %v834_v52  ;;  %v877_v29 = vmul.f32 %v1388_v46, %v1388_v46 }
 0x11a   : > { %v836_v27 = vadd.f32 %v835_v57, %v1383_v41  ;;  %v904_v59 = vadd.f32 %v903_v55, %v873_v54 }
 0x11c   : > { %v905_v31 = vadd.f32 %v904_v59, %v874_v58  ;;  %v837_v60 = vadd.f32 %v836_v27, %v1393_v51 }
 0x11e   : > { %v838_v63 = vadd.f32 %v1378_v36, %v837_v60  ;;  %v906_v0 = vadd.f32 %v905_v31, %v875_v62  ;;  %v880_v36 = vmul.f32 %v1398_v56, %v1398_v56 }
 0x120   : > { %v907_v1 = vadd.f32 %v906_v0, %v876_v25  ;;  %v839_v3 = vadd.f32 %v1388_v46, %v838_v63  ;;  %v881_v46 = vmul.f32 %v1408_v2, %v1408_v2 }
 0x122   : > { %v840_v41 = vadd.f32 %v839_v3, %v1403_v61  ;;  %v908_v5 = vadd.f32 %v907_v1, %v877_v29 }
 0x124   : > { %v909_v6 = vadd.f32 %v908_v5, %v878_v4  ;;  %v841_v51 = vadd.f32 %v840_v41, %v1413_v7  ;;  %v883_v7 = vmul.f32 %v674_v30, %v674_v30 }
 0x126   : > { %v842_v9 = vadd.f32 %v1398_v56, %v841_v51  ;;  %v910_v10 = vadd.f32 %v909_v6, %v879_v8 }
 0x128   : > { %v911_v11 = vadd.f32 %v910_v10, %v880_v36  ;;  %v843_v61 = vadd.f32 %v1408_v2, %v842_v9 }
 0x12a   : > { %v844_v13 = vadd.f32 %v843_v61, %v671_v17  ;;  %v912_v15 = vadd.f32 %v911_v11, %v881_v46 }
 0x12c   : > { %v913_v16 = vadd.f32 %v912_v15, %v882_v14  ;;  %v845_v18 = vadd.f32 %v844_v13, %v674_v30 }
 0x12e   : > { %v846_v56 = vadd.f32 %v1418_v12, %v845_v18  ;;  %v914_v20 = vadd.f32 %v913_v16, %v883_v7 }
 0x130   : > { %v847_v23 = vadd.f32 %v1425_v22, %v846_v56  ;;  %v915_v24 = vadd.f32 %v914_v20, %v884_v19 }
 0x132   : > { %v848_v2 = vrot.slane %v847_v23, 4  ;;  %v916_v26 = vadd.f32 %v915_v24, %v885_v21 }
 0x134   : > { %v849_v17 = vadd.f32 %v848_v2, %v847_v23  ;;  %v917_v28 = vrot.slane %v916_v26, 4 }
 0x136   : > { %v850_v32 = vrot.slane %v849_v17, 2  ;;  %v918_v33 = vadd.f32 %v917_v28, %v916_v26 }
 0x138   : > { %v851_v30 = vadd.f32 %v850_v32, %v849_v17  ;;  %v919_v34 = vrot.slane %v918_v33, 2 }
 0x13a   : > { %v852_v35 = vrot.slane %v851_v30, 1  ;;  %v920_v37 = vadd.f32 %v919_v34, %v918_v33 }
 0x13c   : > { %v921_v12 = vrot.slane %v920_v37, 1  ;;  %v853_v22 = vadd.f32 %v852_v35, %v851_v30 }
 0x13e   : > { %v922_v38 = vadd.f32 %v921_v12, %v920_v37 }
 0x140   : > { %v924_v39 = vsel %vm923_vm0, %v853_v22, %v922_v38 }
 0x141   : > { %925 = vst [vmem:[%s263_s21] sm:$0x3] %v924_v39 }
 0x142 PF: > { %s14_s14 = sadd.s32 1, %s1261_s14   ;;  %s1492_s12 = smov %s1257_s13 }
 0x143   : > { %p11_p6 = scmp.ge.s32.totalorder %s14_s14, 4   ;;  %s1493_s13 = smov %s1495_s15 }
 0x145   :  { %13 = sbr.rel (!%p11_p6) target bundleno = 2 (0x2), region = 81 }

// kernel: basic_block_forward.7
= control target key start
LH: loop header
LB: loop body
LE: loop exit
PB: predicated region body
PF: predicated region fallthrough
CT: control target
= control target key end

     0   :  { %s1224_s0 = inlined_call_operand.vmem [shape: f32[512,128], index: 0, kind: input, shape index: {}]   ;;  %s1225_s1 = inlined_call_operand.vmem [shape: f32[1,128], index: 1, kind: input, shape index: {}]   ;;  %s1226_s2 = inlined_call_operand.vmem [shape: f32[1,128], index: 2, kind: input, shape index: {}]   ;;  %s1227_s3 = inlined_call_operand.vmem [shape: f32[512,128], index: 3, kind: input, shape index: {}]   ;;  %s1228_s4 = inlined_call_operand.vmem [shape: f32[512,128], index: 4, kind: output, shape index: {}]  }
   0x1   :  { %v17_v0 = vld [vmem:[%s1224_s0] sm:$0xff]  ;;  %v18_v4 = vld [vmem:[%s1224_s0 + $0x8] sm:$0xff]  ;;  %v19_v7 = vld [vmem:[%s1224_s0 + $0x10] sm:$0xff] }
   0x2   :  { %v516_v1 = vld [vmem:[%s1225_s1] ss:$0 sm:$0xff]  ;;  %v20_v8 = vld [vmem:[%s1224_s0 + $0x18] sm:$0xff]  ;;  %v224_v10 = vld [vmem:[%s1227_s3 + $0x8] sm:$0xff] }
   0x3   :  { %v521_v2 = vld [vmem:[%s1226_s2] ss:$0 sm:$0xff]  ;;  %v88_v3 = vmul.f32 %v516_v1, %v17_v0  ;;  %v89_v6 = vmul.f32 %v516_v1, %v18_v4  ;;  %v90_v11 = vmul.f32 %v516_v1, %v19_v7  ;;  %v225_v12 = vld [vmem:[%s1227_s3 + $0x10] sm:$0xff]  ;;  %v91_v13 = vmul.f32 %v516_v1, %v20_v8  ;;  %v226_v16 = vld [vmem:[%s1227_s3 + $0x18] sm:$0xff] }
   0x4   :  { %v223_v5 = vld [vmem:[%s1227_s3] sm:$0xff]  ;;  %v22_v18 = vld [vmem:[%s1224_s0 + $0x28] sm:$0xff]  ;;  %v23_v19 = vld [vmem:[%s1224_s0 + $0x30] sm:$0xff] }
   0x5   :  { %v159_v9 = vadd.f32 %v521_v2, %v88_v3  ;;  %v21_v14 = vld [vmem:[%s1224_s0 + $0x20] sm:$0xff]  ;;  %v160_v15 = vadd.f32 %v521_v2, %v89_v6  ;;  %v161_v21 = vadd.f32 %v521_v2, %v90_v11  ;;  %v162_v22 = vadd.f32 %v521_v2, %v91_v13  ;;  %v24_v25 = vld [vmem:[%s1224_s0 + $0x38] sm:$0xff]  ;;  %v228_v28 = vld [vmem:[%s1227_s3 + $0x28] sm:$0xff] }
   0x6   :  { %v92_v17 = vmul.f32 %v516_v1, %v21_v14  ;;  %v227_v23 = vld [vmem:[%s1227_s3 + $0x20] sm:$0xff]  ;;  %v93_v24 = vmul.f32 %v516_v1, %v22_v18  ;;  %v94_v29 = vmul.f32 %v516_v1, %v23_v19  ;;  %v95_v30 = vmul.f32 %v516_v1, %v24_v25  ;;  %v229_v36 = vld [vmem:[%s1227_s3 + $0x30] sm:$0xff]  ;;  %v230_v37 = vld [vmem:[%s1227_s3 + $0x38] sm:$0xff] }
   0x7   :  { %v287_v20 = vadd.f32 %v223_v5, %v159_v9  ;;  %v288_v26 = vadd.f32 %v224_v10, %v160_v15  ;;  %v25_v31 = vld [vmem:[%s1224_s0 + $0x40] sm:$0xff]  ;;  %v289_v33 = vadd.f32 %v225_v12, %v161_v21  ;;  %v290_v34 = vadd.f32 %v226_v16, %v162_v22  ;;  %v26_v38 = vld [vmem:[%s1224_s0 + $0x48] sm:$0xff]  ;;  %v27_v43 = vld [vmem:[%s1224_s0 + $0x50] sm:$0xff] }
   0x8   :  { %v163_v27 = vadd.f32 %v521_v2, %v92_v17  ;;  %v164_v35 = vadd.f32 %v521_v2, %v93_v24  ;;  %v165_v41 = vadd.f32 %v521_v2, %v94_v29  ;;  %v166_v42 = vadd.f32 %v521_v2, %v95_v30  ;;  %v28_v44 = vld [vmem:[%s1224_s0 + $0x58] sm:$0xff]  ;;  %v29_v49 = vld [vmem:[%s1224_s0 + $0x60] sm:$0xff]  ;;  %v30_v55 = vld [vmem:[%s1224_s0 + $0x68] sm:$0xff] }
   0x9   :  { %v351_v32 = vmax.f32 %v287_v20, 0.0  ;;  %v352_v39 = vmax.f32 %v288_v26, 0.0  ;;  %v353_v45 = vmax.f32 %v289_v33, 0.0  ;;  %v354_v46 = vmax.f32 %v290_v34, 0.0  ;;  %v231_v53 = vld [vmem:[%s1227_s3 + $0x40] sm:$0xff]  ;;  %v232_v58 = vld [vmem:[%s1227_s3 + $0x48] sm:$0xff] }
   0xa   :  { %v291_v40 = vadd.f32 %v227_v23, %v163_v27  ;;  %v292_v47 = vadd.f32 %v228_v28, %v164_v35  ;;  %v96_v48 = vmul.f32 %v516_v1, %v25_v31  ;;  %v293_v51 = vadd.f32 %v229_v36, %v165_v41  ;;  %v31_v61 = vld [vmem:[%s1224_s0 + $0x70] sm:$0xff]  ;;  %v32_v62 = vld [vmem:[%s1224_s0 + $0x78] sm:$0xff]  ;;  %v235_v10 = vld [vmem:[%s1227_s3 + $0x60] sm:$0xff] }
   0xb   :  { %415 = vst [vmem:[%s1228_s4] sm:$0xff] %v351_v32  ;;  %416 = vst [vmem:[%s1228_s4 + $0x8] sm:$0xff] %v352_v39  ;;  %v294_v52 = vadd.f32 %v230_v37, %v166_v42  ;;  %v97_v54 = vmul.f32 %v516_v1, %v26_v38  ;;  %v98_v59 = vmul.f32 %v516_v1, %v27_v43  ;;  %v233_v4 = vld [vmem:[%s1227_s3 + $0x50] sm:$0xff]  ;;  %v234_v5 = vld [vmem:[%s1227_s3 + $0x58] sm:$0xff] }
   0xc   :  { %v355_v50 = vmax.f32 %v291_v40, 0.0  ;;  %417 = vst [vmem:[%s1228_s4 + $0x10] sm:$0xff] %v353_v45  ;;  %418 = vst [vmem:[%s1228_s4 + $0x18] sm:$0xff] %v354_v46  ;;  %v356_v56 = vmax.f32 %v292_v47, 0.0  ;;  %v167_v57 = vadd.f32 %v521_v2, %v96_v48  ;;  %v99_v60 = vmul.f32 %v516_v1, %v28_v44  ;;  %v236_v14 = vld [vmem:[%s1227_s3 + $0x68] sm:$0xff]  ;;  %v33_v17 = vld [vmem:[%s1224_s0 + $0x80] sm:$0xff] }
   0xd   :  { %v357_v63 = vmax.f32 %v293_v51, 0.0  ;;  %v358_v0 = vmax.f32 %v294_v52, 0.0  ;;  %v168_v3 = vadd.f32 %v521_v2, %v97_v54  ;;  %v100_v6 = vmul.f32 %v516_v1, %v29_v49  ;;  %v237_v22 = vld [vmem:[%s1227_s3 + $0x70] sm:$0xff]  ;;  %v238_v23 = vld [vmem:[%s1227_s3 + $0x78] sm:$0xff]  ;;  %v34_v24 = vld [vmem:[%s1224_s0 + $0x88] sm:$0xff] }
   0xe   :  { %419 = vst [vmem:[%s1228_s4 + $0x20] sm:$0xff] %v355_v50  ;;  %420 = vst [vmem:[%s1228_s4 + $0x28] sm:$0xff] %v356_v56  ;;  %v295_v7 = vadd.f32 %v231_v53, %v167_v57  ;;  %v169_v8 = vadd.f32 %v521_v2, %v98_v59  ;;  %v170_v9 = vadd.f32 %v521_v2, %v99_v60  ;;  %v35_v29 = vld [vmem:[%s1224_s0 + $0x90] sm:$0xff]  ;;  %v36_v30 = vld [vmem:[%s1224_s0 + $0x98] sm:$0xff] }
   0xf   :  { %v101_v11 = vmul.f32 %v516_v1, %v30_v55  ;;  %421 = vst [vmem:[%s1228_s4 + $0x30] sm:$0xff] %v357_v63  ;;  %422 = vst [vmem:[%s1228_s4 + $0x38] sm:$0xff] %v358_v0  ;;  %v296_v12 = vadd.f32 %v232_v58, %v168_v3  ;;  %v171_v13 = vadd.f32 %v521_v2, %v100_v6  ;;  %v37_v35 = vld [vmem:[%s1224_s0 + $0xa0] sm:$0xff]  ;;  %v38_v41 = vld [vmem:[%s1224_s0 + $0xa8] sm:$0xff] }
  0x10   :  { %v102_v15 = vmul.f32 %v516_v1, %v31_v61  ;;  %v103_v16 = vmul.f32 %v516_v1, %v32_v62  ;;  %v359_v18 = vmax.f32 %v295_v7, 0.0  ;;  %v297_v19 = vadd.f32 %v233_v4, %v169_v8  ;;  %v239_v39 = vld [vmem:[%s1227_s3 + $0x80] sm:$0xff]  ;;  %v240_v44 = vld [vmem:[%s1227_s3 + $0x88] sm:$0xff]  ;;  %v39_v47 = vld [vmem:[%s1224_s0 + $0xb0] sm:$0xff] }
  0x11   :  { %v298_v20 = vadd.f32 %v234_v5, %v170_v9  ;;  %v172_v21 = vadd.f32 %v521_v2, %v101_v11  ;;  %v360_v25 = vmax.f32 %v296_v12, 0.0  ;;  %v299_v26 = vadd.f32 %v235_v10, %v171_v13  ;;  %v40_v48 = vld [vmem:[%s1224_s0 + $0xb8] sm:$0xff]  ;;  %v241_v52 = vld [vmem:[%s1227_s3 + $0x90] sm:$0xff]  ;;  %v243_v58 = vld [vmem:[%s1227_s3 + $0xa0] sm:$0xff] }
  0x12   :  { %v173_v27 = vadd.f32 %v521_v2, %v102_v15  ;;  %v174_v28 = vadd.f32 %v521_v2, %v103_v16  ;;  %423 = vst [vmem:[%s1228_s4 + $0x40] sm:$0xff] %v359_v18  ;;  %v361_v31 = vmax.f32 %v297_v19, 0.0  ;;  %v104_v34 = vmul.f32 %v516_v1, %v33_v17  ;;  %v242_v53 = vld [vmem:[%s1227_s3 + $0x98] sm:$0xff]  ;;  %v244_v62 = vld [vmem:[%s1227_s3 + $0xa8] sm:$0xff]  ;;  %v41_v3 = vld [vmem:[%s1224_s0 + $0xc0] sm:$0xff] }
  0x13   :  { %v362_v32 = vmax.f32 %v298_v20, 0.0  ;;  %v300_v33 = vadd.f32 %v236_v14, %v172_v21  ;;  %424 = vst [vmem:[%s1228_s4 + $0x48] sm:$0xff] %v360_v25  ;;  %v363_v36 = vmax.f32 %v299_v26, 0.0  ;;  %v105_v40 = vmul.f32 %v516_v1, %v34_v24  ;;  %v245_v8 = vld [vmem:[%s1227_s3 + $0xb0] sm:$0xff]  ;;  %v246_v9 = vld [vmem:[%s1227_s3 + $0xb8] sm:$0xff]  ;;  %v42_v10 = vld [vmem:[%s1224_s0 + $0xc8] sm:$0xff] }
  0x14   :  { %v301_v37 = vadd.f32 %v237_v22, %v173_v27  ;;  %v302_v38 = vadd.f32 %v238_v23, %v174_v28  ;;  %425 = vst [vmem:[%s1228_s4 + $0x50] sm:$0xff] %v361_v31  ;;  %v175_v43 = vadd.f32 %v521_v2, %v104_v34  ;;  %v106_v45 = vmul.f32 %v516_v1, %v35_v29  ;;  %v43_v15 = vld [vmem:[%s1224_s0 + $0xd0] sm:$0xff]  ;;  %v44_v16 = vld [vmem:[%s1224_s0 + $0xd8] sm:$0xff]  ;;  %v45_v21 = vld [vmem:[%s1224_s0 + $0xe0] sm:$0xff] }
  0x15   :  { %426 = vst [vmem:[%s1228_s4 + $0x58] sm:$0xff] %v362_v32  ;;  %v364_v42 = vmax.f32 %v300_v33, 0.0  ;;  %v107_v46 = vmul.f32 %v516_v1, %v36_v30  ;;  %427 = vst [vmem:[%s1228_s4 + $0x60] sm:$0xff] %v363_v36  ;;  %v176_v51 = vadd.f32 %v521_v2, %v105_v40  ;;  %v108_v54 = vmul.f32 %v516_v1, %v37_v35  ;;  %v247_v25 = vld [vmem:[%s1227_s3 + $0xc0] sm:$0xff]  ;;  %v46_v27 = vld [vmem:[%s1224_s0 + $0xe8] sm:$0xff] }
  0x16   :  { %v365_v49 = vmax.f32 %v301_v37, 0.0  ;;  %v366_v50 = vmax.f32 %v302_v38, 0.0  ;;  %v303_v55 = vadd.f32 %v239_v39, %v175_v43  ;;  %v177_v56 = vadd.f32 %v521_v2, %v106_v45  ;;  %v248_v30 = vld [vmem:[%s1227_s3 + $0xc8] sm:$0xff]  ;;  %v47_v33 = vld [vmem:[%s1224_s0 + $0xf0] sm:$0xff]  ;;  %v48_v34 = vld [vmem:[%s1224_s0 + $0xf8] sm:$0xff] }
  0x17   :  { %428 = vst [vmem:[%s1228_s4 + $0x68] sm:$0xff] %v364_v42  ;;  %v178_v57 = vadd.f32 %v521_v2, %v107_v46  ;;  %v109_v59 = vmul.f32 %v516_v1, %v38_v41  ;;  %v304_v60 = vadd.f32 %v240_v44, %v176_v51  ;;  %v179_v61 = vadd.f32 %v521_v2, %v108_v54  ;;  %v249_v38 = vld [vmem:[%s1227_s3 + $0xd0] sm:$0xff]  ;;  %v250_v39 = vld [vmem:[%s1227_s3 + $0xd8] sm:$0xff]  ;;  %v251_v44 = vld [vmem:[%s1227_s3 + $0xe0] sm:$0xff] }
  0x18   :  { %429 = vst [vmem:[%s1228_s4 + $0x70] sm:$0xff] %v365_v49  ;;  %430 = vst [vmem:[%s1228_s4 + $0x78] sm:$0xff] %v366_v50  ;;  %v110_v63 = vmul.f32 %v516_v1, %v39_v47  ;;  %v111_v0 = vmul.f32 %v516_v1, %v40_v48  ;;  %v367_v4 = vmax.f32 %v303_v55, 0.0  ;;  %v305_v5 = vadd.f32 %v241_v52, %v177_v56  ;;  %v252_v48 = vld [vmem:[%s1227_s3 + $0xe8] sm:$0xff]  ;;  %v49_v51 = vld [vmem:[%s1224_s0 + $0x100] sm:$0xff] }
  0x19   :  { %v306_v6 = vadd.f32 %v242_v53, %v178_v57  ;;  %v180_v7 = vadd.f32 %v521_v2, %v109_v59  ;;  %v368_v11 = vmax.f32 %v304_v60, 0.0  ;;  %v307_v12 = vadd.f32 %v243_v58, %v179_v61  ;;  %v253_v56 = vld [vmem:[%s1227_s3 + $0xf0] sm:$0xff]  ;;  %v254_v57 = vld [vmem:[%s1227_s3 + $0xf8] sm:$0xff]  ;;  %v50_v58 = vld [vmem:[%s1224_s0 + $0x108] sm:$0xff] }
  0x1a   :  { %v181_v13 = vadd.f32 %v521_v2, %v110_v63  ;;  %v182_v14 = vadd.f32 %v521_v2, %v111_v0  ;;  %431 = vst [vmem:[%s1228_s4 + $0x80] sm:$0xff] %v367_v4  ;;  %v369_v17 = vmax.f32 %v305_v5, 0.0  ;;  %v112_v20 = vmul.f32 %v516_v1, %v41_v3  ;;  %v51_v63 = vld [vmem:[%s1224_s0 + $0x110] sm:$0xff]  ;;  %v52_v0 = vld [vmem:[%s1224_s0 + $0x118] sm:$0xff] }
  0x1b   :  { %v370_v18 = vmax.f32 %v306_v6, 0.0  ;;  %v308_v19 = vadd.f32 %v244_v62, %v180_v7  ;;  %432 = vst [vmem:[%s1228_s4 + $0x88] sm:$0xff] %v368_v11  ;;  %v371_v22 = vmax.f32 %v307_v12, 0.0  ;;  %v113_v26 = vmul.f32 %v516_v1, %v42_v10  ;;  %v53_v7 = vld [vmem:[%s1224_s0 + $0x120] sm:$0xff] }
  0x1c   :  { %v309_v23 = vadd.f32 %v245_v8, %v181_v13  ;;  %v310_v24 = vadd.f32 %v246_v9, %v182_v14  ;;  %433 = vst [vmem:[%s1228_s4 + $0x90] sm:$0xff] %v369_v17  ;;  %v183_v29 = vadd.f32 %v521_v2, %v112_v20  ;;  %v114_v31 = vmul.f32 %v516_v1, %v43_v15  ;;  %v255_v11 = vld [vmem:[%s1227_s3 + $0x100] sm:$0xff]  ;;  %v54_v13 = vld [vmem:[%s1224_s0 + $0x128] sm:$0xff]  ;;  %v56_v20 = vld [vmem:[%s1224_s0 + $0x138] sm:$0xff] }
  0x1d   :  { %434 = vst [vmem:[%s1228_s4 + $0x98] sm:$0xff] %v370_v18  ;;  %v372_v28 = vmax.f32 %v308_v19, 0.0  ;;  %v115_v32 = vmul.f32 %v516_v1, %v44_v16  ;;  %435 = vst [vmem:[%s1228_s4 + $0xa0] sm:$0xff] %v371_v22  ;;  %v184_v37 = vadd.f32 %v521_v2, %v113_v26  ;;  %v116_v40 = vmul.f32 %v516_v1, %v45_v21  ;;  %v256_v16 = vld [vmem:[%s1227_s3 + $0x108] sm:$0xff]  ;;  %v55_v19 = vld [vmem:[%s1224_s0 + $0x130] sm:$0xff] }
  0x1e   :  { %v373_v35 = vmax.f32 %v309_v23, 0.0  ;;  %v374_v36 = vmax.f32 %v310_v24, 0.0  ;;  %v311_v41 = vadd.f32 %v247_v25, %v183_v29  ;;  %v185_v42 = vadd.f32 %v521_v2, %v114_v31  ;;  %v257_v24 = vld [vmem:[%s1227_s3 + $0x110] sm:$0xff]  ;;  %v258_v25 = vld [vmem:[%s1227_s3 + $0x118] sm:$0xff] }
  0x1f   :  { %436 = vst [vmem:[%s1228_s4 + $0xa8] sm:$0xff] %v372_v28  ;;  %v186_v43 = vadd.f32 %v521_v2, %v115_v32  ;;  %v117_v45 = vmul.f32 %v516_v1, %v46_v27  ;;  %v312_v46 = vadd.f32 %v248_v30, %v184_v37  ;;  %v187_v47 = vadd.f32 %v521_v2, %v116_v40  ;;  %v259_v30 = vld [vmem:[%s1227_s3 + $0x120] sm:$0xff] }
  0x20   :  { %437 = vst [vmem:[%s1228_s4 + $0xb0] sm:$0xff] %v373_v35  ;;  %438 = vst [vmem:[%s1228_s4 + $0xb8] sm:$0xff] %v374_v36  ;;  %v118_v49 = vmul.f32 %v516_v1, %v47_v33  ;;  %v119_v50 = vmul.f32 %v516_v1, %v48_v34  ;;  %v375_v52 = vmax.f32 %v311_v41, 0.0  ;;  %v313_v53 = vadd.f32 %v249_v38, %v185_v42  ;;  %v260_v34 = vld [vmem:[%s1227_s3 + $0x128] sm:$0xff]  ;;  %v57_v37 = vld [vmem:[%s1224_s0 + $0x140] sm:$0xff] }
  0x21   :  { %v314_v54 = vadd.f32 %v250_v39, %v186_v43  ;;  %v188_v55 = vadd.f32 %v521_v2, %v117_v45  ;;  %v376_v59 = vmax.f32 %v312_v46, 0.0  ;;  %v315_v60 = vadd.f32 %v251_v44, %v187_v47  ;;  %v261_v42 = vld [vmem:[%s1227_s3 + $0x130] sm:$0xff]  ;;  %v262_v43 = vld [vmem:[%s1227_s3 + $0x138] sm:$0xff]  ;;  %v58_v44 = vld [vmem:[%s1224_s0 + $0x148] sm:$0xff] }
  0x22   :  { %v189_v61 = vadd.f32 %v521_v2, %v118_v49  ;;  %v190_v62 = vadd.f32 %v521_v2, %v119_v50  ;;  %439 = vst [vmem:[%s1228_s4 + $0xc0] sm:$0xff] %v375_v52  ;;  %v377_v3 = vmax.f32 %v313_v53, 0.0  ;;  %v120_v6 = vmul.f32 %v516_v1, %v49_v51  ;;  %v59_v49 = vld [vmem:[%s1224_s0 + $0x150] sm:$0xff]  ;;  %v60_v50 = vld [vmem:[%s1224_s0 + $0x158] sm:$0xff] }
  0x23   :  { %v378_v4 = vmax.f32 %v314_v54, 0.0  ;;  %v316_v5 = vadd.f32 %v252_v48, %v188_v55  ;;  %440 = vst [vmem:[%s1228_s4 + $0xc8] sm:$0xff] %v376_v59  ;;  %v379_v8 = vmax.f32 %v315_v60, 0.0  ;;  %v121_v12 = vmul.f32 %v516_v1, %v50_v58  ;;  %v61_v55 = vld [vmem:[%s1224_s0 + $0x160] sm:$0xff] }
  0x24   :  { %v317_v9 = vadd.f32 %v253_v56, %v189_v61  ;;  %v318_v10 = vadd.f32 %v254_v57, %v190_v62  ;;  %441 = vst [vmem:[%s1228_s4 + $0xd0] sm:$0xff] %v377_v3  ;;  %v191_v15 = vadd.f32 %v521_v2, %v120_v6  ;;  %v122_v17 = vmul.f32 %v516_v1, %v51_v63  ;;  %v263_v59 = vld [vmem:[%s1227_s3 + $0x140] sm:$0xff]  ;;  %v62_v61 = vld [vmem:[%s1224_s0 + $0x168] sm:$0xff]  ;;  %v64_v6 = vld [vmem:[%s1224_s0 + $0x178] sm:$0xff] }
  0x25   :  { %442 = vst [vmem:[%s1228_s4 + $0xd8] sm:$0xff] %v378_v4  ;;  %v380_v14 = vmax.f32 %v316_v5, 0.0  ;;  %v123_v18 = vmul.f32 %v516_v1, %v52_v0  ;;  %443 = vst [vmem:[%s1228_s4 + $0xe0] sm:$0xff] %v379_v8  ;;  %v192_v23 = vadd.f32 %v521_v2, %v121_v12  ;;  %v124_v26 = vmul.f32 %v516_v1, %v53_v7  ;;  %v264_v0 = vld [vmem:[%s1227_s3 + $0x148] sm:$0xff]  ;;  %v63_v5 = vld [vmem:[%s1224_s0 + $0x170] sm:$0xff] }
  0x26   :  { %v381_v21 = vmax.f32 %v317_v9, 0.0  ;;  %v382_v22 = vmax.f32 %v318_v10, 0.0  ;;  %v319_v27 = vadd.f32 %v255_v11, %v191_v15  ;;  %v193_v28 = vadd.f32 %v521_v2, %v122_v17  ;;  %v265_v10 = vld [vmem:[%s1227_s3 + $0x150] sm:$0xff]  ;;  %v266_v11 = vld [vmem:[%s1227_s3 + $0x158] sm:$0xff] }
  0x27   :  { %444 = vst [vmem:[%s1228_s4 + $0xe8] sm:$0xff] %v380_v14  ;;  %v194_v29 = vadd.f32 %v521_v2, %v123_v18  ;;  %v125_v31 = vmul.f32 %v516_v1, %v54_v13  ;;  %v320_v32 = vadd.f32 %v256_v16, %v192_v23  ;;  %v195_v33 = vadd.f32 %v521_v2, %v124_v26  ;;  %v267_v16 = vld [vmem:[%s1227_s3 + $0x160] sm:$0xff] }
  0x28   :  { %445 = vst [vmem:[%s1228_s4 + $0xf0] sm:$0xff] %v381_v21  ;;  %446 = vst [vmem:[%s1228_s4 + $0xf8] sm:$0xff] %v382_v22  ;;  %v126_v35 = vmul.f32 %v516_v1, %v55_v19  ;;  %v127_v36 = vmul.f32 %v516_v1, %v56_v20  ;;  %v383_v38 = vmax.f32 %v319_v27, 0.0  ;;  %v321_v39 = vadd.f32 %v257_v24, %v193_v28  ;;  %v268_v20 = vld [vmem:[%s1227_s3 + $0x168] sm:$0xff]  ;;  %v65_v23 = vld [vmem:[%s1224_s0 + $0x180] sm:$0xff] }
  0x29   :  { %v322_v40 = vadd.f32 %v258_v25, %v194_v29  ;;  %v196_v41 = vadd.f32 %v521_v2, %v125_v31  ;;  %v384_v45 = vmax.f32 %v320_v32, 0.0  ;;  %v323_v46 = vadd.f32 %v259_v30, %v195_v33  ;;  %v269_v28 = vld [vmem:[%s1227_s3 + $0x170] sm:$0xff]  ;;  %v270_v29 = vld [vmem:[%s1227_s3 + $0x178] sm:$0xff]  ;;  %v66_v30 = vld [vmem:[%s1224_s0 + $0x188] sm:$0xff] }
  0x2a   :  { %v197_v47 = vadd.f32 %v521_v2, %v126_v35  ;;  %v198_v48 = vadd.f32 %v521_v2, %v127_v36  ;;  %447 = vst [vmem:[%s1228_s4 + $0x100] sm:$0xff] %v383_v38  ;;  %v385_v51 = vmax.f32 %v321_v39, 0.0  ;;  %v128_v54 = vmul.f32 %v516_v1, %v57_v37  ;;  %v67_v35 = vld [vmem:[%s1224_s0 + $0x190] sm:$0xff]  ;;  %v68_v36 = vld [vmem:[%s1224_s0 + $0x198] sm:$0xff] }
  0x2b   :  { %v386_v52 = vmax.f32 %v322_v40, 0.0  ;;  %v324_v53 = vadd.f32 %v260_v34, %v196_v41  ;;  %448 = vst [vmem:[%s1228_s4 + $0x108] sm:$0xff] %v384_v45  ;;  %v387_v56 = vmax.f32 %v323_v46, 0.0  ;;  %v129_v60 = vmul.f32 %v516_v1, %v58_v44  ;;  %v69_v41 = vld [vmem:[%s1224_s0 + $0x1a0] sm:$0xff] }
  0x2c   :  { %v325_v57 = vadd.f32 %v261_v42, %v197_v47  ;;  %v326_v58 = vadd.f32 %v262_v43, %v198_v48  ;;  %449 = vst [vmem:[%s1228_s4 + $0x110] sm:$0xff] %v385_v51  ;;  %v199_v63 = vadd.f32 %v521_v2, %v128_v54  ;;  %v130_v3 = vmul.f32 %v516_v1, %v59_v49  ;;  %v271_v45 = vld [vmem:[%s1227_s3 + $0x180] sm:$0xff]  ;;  %v70_v47 = vld [vmem:[%s1224_s0 + $0x1a8] sm:$0xff]  ;;  %v72_v54 = vld [vmem:[%s1224_s0 + $0x1b8] sm:$0xff] }
  0x2d   :  { %450 = vst [vmem:[%s1228_s4 + $0x118] sm:$0xff] %v386_v52  ;;  %v388_v62 = vmax.f32 %v324_v53, 0.0  ;;  %v131_v4 = vmul.f32 %v516_v1, %v60_v50  ;;  %451 = vst [vmem:[%s1228_s4 + $0x120] sm:$0xff] %v387_v56  ;;  %v200_v9 = vadd.f32 %v521_v2, %v129_v60  ;;  %v132_v12 = vmul.f32 %v516_v1, %v61_v55  ;;  %v272_v50 = vld [vmem:[%s1227_s3 + $0x188] sm:$0xff]  ;;  %v71_v53 = vld [vmem:[%s1224_s0 + $0x1b0] sm:$0xff] }
  0x2e   :  { %v389_v7 = vmax.f32 %v325_v57, 0.0  ;;  %v390_v8 = vmax.f32 %v326_v58, 0.0  ;;  %v327_v13 = vadd.f32 %v263_v59, %v199_v63  ;;  %v201_v14 = vadd.f32 %v521_v2, %v130_v3  ;;  %v273_v58 = vld [vmem:[%s1227_s3 + $0x190] sm:$0xff]  ;;  %v274_v59 = vld [vmem:[%s1227_s3 + $0x198] sm:$0xff] }
  0x2f   :  { %452 = vst [vmem:[%s1228_s4 + $0x128] sm:$0xff] %v388_v62  ;;  %v202_v15 = vadd.f32 %v521_v2, %v131_v4  ;;  %v133_v17 = vmul.f32 %v516_v1, %v62_v61  ;;  %v328_v18 = vadd.f32 %v264_v0, %v200_v9  ;;  %v203_v19 = vadd.f32 %v521_v2, %v132_v12  ;;  %v275_v0 = vld [vmem:[%s1227_s3 + $0x1a0] sm:$0xff] }
  0x30   :  { %453 = vst [vmem:[%s1228_s4 + $0x130] sm:$0xff] %v389_v7  ;;  %454 = vst [vmem:[%s1228_s4 + $0x138] sm:$0xff] %v390_v8  ;;  %v134_v21 = vmul.f32 %v516_v1, %v63_v5  ;;  %v135_v22 = vmul.f32 %v516_v1, %v64_v6  ;;  %v391_v24 = vmax.f32 %v327_v13, 0.0  ;;  %v329_v25 = vadd.f32 %v265_v10, %v201_v14  ;;  %v276_v6 = vld [vmem:[%s1227_s3 + $0x1a8] sm:$0xff]  ;;  %v73_v9 = vld [vmem:[%s1224_s0 + $0x1c0] sm:$0xff] }
  0x31   :  { %v330_v26 = vadd.f32 %v266_v11, %v202_v15  ;;  %v204_v27 = vadd.f32 %v521_v2, %v133_v17  ;;  %v392_v31 = vmax.f32 %v328_v18, 0.0  ;;  %v331_v32 = vadd.f32 %v267_v16, %v203_v19  ;;  %v277_v14 = vld [vmem:[%s1227_s3 + $0x1b0] sm:$0xff]  ;;  %v278_v15 = vld [vmem:[%s1227_s3 + $0x1b8] sm:$0xff]  ;;  %v74_v16 = vld [vmem:[%s1224_s0 + $0x1c8] sm:$0xff] }
  0x32   :  { %v205_v33 = vadd.f32 %v521_v2, %v134_v21  ;;  %v206_v34 = vadd.f32 %v521_v2, %v135_v22  ;;  %455 = vst [vmem:[%s1228_s4 + $0x140] sm:$0xff] %v391_v24  ;;  %v393_v37 = vmax.f32 %v329_v25, 0.0  ;;  %v136_v40 = vmul.f32 %v516_v1, %v65_v23  ;;  %v75_v21 = vld [vmem:[%s1224_s0 + $0x1d0] sm:$0xff]  ;;  %v76_v22 = vld [vmem:[%s1224_s0 + $0x1d8] sm:$0xff] }
  0x33   :  { %v394_v38 = vmax.f32 %v330_v26, 0.0  ;;  %v332_v39 = vadd.f32 %v268_v20, %v204_v27  ;;  %456 = vst [vmem:[%s1228_s4 + $0x148] sm:$0xff] %v392_v31  ;;  %v395_v42 = vmax.f32 %v331_v32, 0.0  ;;  %v137_v46 = vmul.f32 %v516_v1, %v66_v30  ;;  %v77_v27 = vld [vmem:[%s1224_s0 + $0x1e0] sm:$0xff] }
  0x34   :  { %v333_v43 = vadd.f32 %v269_v28, %v205_v33  ;;  %v334_v44 = vadd.f32 %v270_v29, %v206_v34  ;;  %457 = vst [vmem:[%s1228_s4 + $0x150] sm:$0xff] %v393_v37  ;;  %v207_v49 = vadd.f32 %v521_v2, %v136_v40  ;;  %v138_v51 = vmul.f32 %v516_v1, %v67_v35  ;;  %v279_v31 = vld [vmem:[%s1227_s3 + $0x1c0] sm:$0xff]  ;;  %v78_v33 = vld [vmem:[%s1224_s0 + $0x1e8] sm:$0xff]  ;;  %v80_v40 = vld [vmem:[%s1224_s0 + $0x1f8] sm:$0xff] }
  0x35   :  { %458 = vst [vmem:[%s1228_s4 + $0x158] sm:$0xff] %v394_v38  ;;  %v396_v48 = vmax.f32 %v332_v39, 0.0  ;;  %v139_v52 = vmul.f32 %v516_v1, %v68_v36  ;;  %459 = vst [vmem:[%s1228_s4 + $0x160] sm:$0xff] %v395_v42  ;;  %v208_v57 = vadd.f32 %v521_v2, %v137_v46  ;;  %v140_v60 = vmul.f32 %v516_v1, %v69_v41  ;;  %v280_v36 = vld [vmem:[%s1227_s3 + $0x1c8] sm:$0xff]  ;;  %v79_v39 = vld [vmem:[%s1224_s0 + $0x1f0] sm:$0xff] }
  0x36   :  { %v397_v55 = vmax.f32 %v333_v43, 0.0  ;;  %v398_v56 = vmax.f32 %v334_v44, 0.0  ;;  %v335_v61 = vadd.f32 %v271_v45, %v207_v49  ;;  %v209_v62 = vadd.f32 %v521_v2, %v138_v51  ;;  %v281_v44 = vld [vmem:[%s1227_s3 + $0x1d0] sm:$0xff]  ;;  %v282_v45 = vld [vmem:[%s1227_s3 + $0x1d8] sm:$0xff] }
  0x37   :  { %460 = vst [vmem:[%s1228_s4 + $0x168] sm:$0xff] %v396_v48  ;;  %v210_v63 = vadd.f32 %v521_v2, %v139_v52  ;;  %v141_v3 = vmul.f32 %v516_v1, %v70_v47  ;;  %v336_v4 = vadd.f32 %v272_v50, %v208_v57  ;;  %v211_v5 = vadd.f32 %v521_v2, %v140_v60  ;;  %v283_v50 = vld [vmem:[%s1227_s3 + $0x1e0] sm:$0xff] }
  0x38   :  { %461 = vst [vmem:[%s1228_s4 + $0x170] sm:$0xff] %v397_v55  ;;  %462 = vst [vmem:[%s1228_s4 + $0x178] sm:$0xff] %v398_v56  ;;  %v142_v7 = vmul.f32 %v516_v1, %v71_v53  ;;  %v143_v8 = vmul.f32 %v516_v1, %v72_v54  ;;  %v399_v10 = vmax.f32 %v335_v61, 0.0  ;;  %v337_v11 = vadd.f32 %v273_v58, %v209_v62  ;;  %v284_v54 = vld [vmem:[%s1227_s3 + $0x1e8] sm:$0xff]  ;;  %v285_v61 = vld [vmem:[%s1227_s3 + $0x1f0] sm:$0xff] }
  0x39   :  { %v338_v12 = vadd.f32 %v274_v59, %v210_v63  ;;  %v212_v13 = vadd.f32 %v521_v2, %v141_v3  ;;  %v400_v17 = vmax.f32 %v336_v4, 0.0  ;;  %v339_v18 = vadd.f32 %v275_v0, %v211_v5  ;;  %v286_v62 = vld [vmem:[%s1227_s3 + $0x1f8] sm:$0xff] }
  0x3a   :  { %v213_v19 = vadd.f32 %v521_v2, %v142_v7  ;;  %v214_v20 = vadd.f32 %v521_v2, %v143_v8  ;;  %463 = vst [vmem:[%s1228_s4 + $0x180] sm:$0xff] %v399_v10  ;;  %v401_v23 = vmax.f32 %v337_v11, 0.0  ;;  %v144_v26 = vmul.f32 %v516_v1, %v73_v9 }
  0x3b   :  { %v402_v24 = vmax.f32 %v338_v12, 0.0  ;;  %v340_v25 = vadd.f32 %v276_v6, %v212_v13  ;;  %464 = vst [vmem:[%s1228_s4 + $0x188] sm:$0xff] %v400_v17  ;;  %v403_v28 = vmax.f32 %v339_v18, 0.0  ;;  %v145_v32 = vmul.f32 %v516_v1, %v74_v16 }
  0x3c   :  { %v341_v29 = vadd.f32 %v277_v14, %v213_v19  ;;  %v342_v30 = vadd.f32 %v278_v15, %v214_v20  ;;  %465 = vst [vmem:[%s1228_s4 + $0x190] sm:$0xff] %v401_v23  ;;  %v215_v35 = vadd.f32 %v521_v2, %v144_v26  ;;  %v146_v37 = vmul.f32 %v516_v1, %v75_v21 }
  0x3d   :  { %466 = vst [vmem:[%s1228_s4 + $0x198] sm:$0xff] %v402_v24  ;;  %v404_v34 = vmax.f32 %v340_v25, 0.0  ;;  %v147_v38 = vmul.f32 %v516_v1, %v76_v22  ;;  %467 = vst [vmem:[%s1228_s4 + $0x1a0] sm:$0xff] %v403_v28  ;;  %v216_v43 = vadd.f32 %v521_v2, %v145_v32  ;;  %v148_v46 = vmul.f32 %v516_v1, %v77_v27 }
  0x3e   :  { %v405_v41 = vmax.f32 %v341_v29, 0.0  ;;  %v406_v42 = vmax.f32 %v342_v30, 0.0  ;;  %v343_v47 = vadd.f32 %v279_v31, %v215_v35  ;;  %v217_v48 = vadd.f32 %v521_v2, %v146_v37 }
  0x3f   :  { %468 = vst [vmem:[%s1228_s4 + $0x1a8] sm:$0xff] %v404_v34  ;;  %v218_v49 = vadd.f32 %v521_v2, %v147_v38  ;;  %v149_v51 = vmul.f32 %v516_v1, %v78_v33  ;;  %v344_v52 = vadd.f32 %v280_v36, %v216_v43  ;;  %v219_v53 = vadd.f32 %v521_v2, %v148_v46 }
  0x40   :  { %469 = vst [vmem:[%s1228_s4 + $0x1b0] sm:$0xff] %v405_v41  ;;  %470 = vst [vmem:[%s1228_s4 + $0x1b8] sm:$0xff] %v406_v42  ;;  %v150_v55 = vmul.f32 %v516_v1, %v79_v39  ;;  %v151_v56 = vmul.f32 %v516_v1, %v80_v40  ;;  %v407_v57 = vmax.f32 %v343_v47, 0.0  ;;  %v345_v58 = vadd.f32 %v281_v44, %v217_v48 }
  0x41   :  { %v346_v59 = vadd.f32 %v282_v45, %v218_v49  ;;  %v220_v60 = vadd.f32 %v521_v2, %v149_v51  ;;  %v408_v63 = vmax.f32 %v344_v52, 0.0  ;;  %v347_v0 = vadd.f32 %v283_v50, %v219_v53 }
  0x42   :  { %v221_v3 = vadd.f32 %v521_v2, %v150_v55  ;;  %v222_v4 = vadd.f32 %v521_v2, %v151_v56  ;;  %471 = vst [vmem:[%s1228_s4 + $0x1c0] sm:$0xff] %v407_v57  ;;  %v409_v1 = vmax.f32 %v345_v58, 0.0 }
  0x43   :  { %v410_v5 = vmax.f32 %v346_v59, 0.0  ;;  %v348_v6 = vadd.f32 %v284_v54, %v220_v60  ;;  %472 = vst [vmem:[%s1228_s4 + $0x1c8] sm:$0xff] %v408_v63  ;;  %v411_v7 = vmax.f32 %v347_v0, 0.0 }
  0x44   :  { %v349_v8 = vadd.f32 %v285_v61, %v221_v3  ;;  %v350_v9 = vadd.f32 %v286_v62, %v222_v4  ;;  %473 = vst [vmem:[%s1228_s4 + $0x1d0] sm:$0xff] %v409_v1 }
  0x45   :  { %474 = vst [vmem:[%s1228_s4 + $0x1d8] sm:$0xff] %v410_v5  ;;  %v412_v2 = vmax.f32 %v348_v6, 0.0  ;;  %475 = vst [vmem:[%s1228_s4 + $0x1e0] sm:$0xff] %v411_v7 }
  0x46   :  { %v413_v10 = vmax.f32 %v349_v8, 0.0  ;;  %v414_v11 = vmax.f32 %v350_v9, 0.0 }
  0x47   :  { %476 = vst [vmem:[%s1228_s4 + $0x1e8] sm:$0xff] %v412_v2 }
  0x48   :  { %477 = vst [vmem:[%s1228_s4 + $0x1f0] sm:$0xff] %v413_v10  ;;  %478 = vst [vmem:[%s1228_s4 + $0x1f8] sm:$0xff] %v414_v11 }

</bundles_post_ra>
